<compile_context>
chip_gen: v5e
topology: v5e:2x2
jax: 0.10.0
libtpu: 0.0.40
codegen_flags: <defaults>
</compile_context>

<pallas_src>
import functools

import jax
import jax.numpy as jnp
from jax.experimental import pallas as pl
from jax.experimental.pallas import tpu as pltpu


# Tap offsets (oy, ox) for a 3x3 kernel, ordered (ky, kx) row-major so that tap
# t pairs with weight block w[:, :, t // 3, t % 3].
_TAPS = tuple((ky - 1, kx - 1) for ky in range(3) for kx in range(3))


def _rcab_kernel(x_ref, mask_ref, w1_ref, b1_ref, w2_ref, b2_ref,
                 wd_ref, bd_ref, wu_ref, bu_ref,
                 out_ref, patch_ref, *, H, W, C):
    HW = H * W

    x = x_ref[0]                                          # (C, HW) f32

    def build_patches(img):
        """im2col: write the 9 shifted+masked taps of `img` into patch_ref (bf16)."""
        for t, (oy, ox) in enumerate(_TAPS):
            k = oy * W + ox
            if k == 0:
                tap = img                                  # centre tap: no shift/mask
            else:
                # shifted[:, r] == img[:, (r + k) % HW]; wrapped lanes are
                # exactly the out-of-image positions and get zeroed by the mask.
                shifted = pltpu.roll(img, (-k) % HW, 1)
                tap = shifted * mask_ref[t]                # (C,HW) * (1,HW) bcast
            patch_ref[t * C:(t + 1) * C, :] = tap.astype(jnp.bfloat16)

    # ---- conv1 (3x3, pad=1) + ReLU : single fused K=9C MXU matmul -----------
    build_patches(x)
    y1 = jnp.dot(w1_ref[...], patch_ref[...],
                 preferred_element_type=jnp.float32) + b1_ref[...]
    y1 = jnp.maximum(y1, 0.0)                              # (C, HW) f32

    # ---- conv2 (3x3, pad=1) --------------------------------------------------
    build_patches(y1)
    y2 = jnp.dot(w2_ref[...], patch_ref[...],
                 preferred_element_type=jnp.float32) + b2_ref[...]   # (C, HW)

    # ---- channel attention: avgpool -> 1x1 -> ReLU -> 1x1 -> sigmoid ---------
    pooled = jnp.mean(y2, axis=1, keepdims=True)           # (C, 1)
    hid = jnp.maximum(
        jnp.dot(wd_ref[...], pooled, preferred_element_type=jnp.float32)
        + bd_ref[...], 0.0)                                # (Cr, 1)
    scale = jax.nn.sigmoid(
        jnp.dot(wu_ref[...], hid, preferred_element_type=jnp.float32)
        + bu_ref[...])                                     # (C, 1)

    # ---- residual add (lane-dense store) -------------------------------------
    out_ref[0] = (x + y2 * scale).astype(out_ref.dtype)


def rcab_forward(x_nchw, params):
    """x_nchw: (N, C, H, W) float32.  params: PyTorch-layout weights (OIHW / OI)."""
    N, C, H, W = x_nchw.shape
    HW = H * W
    Cr = params["wd"].shape[0]

    # Conv weights -> (Cout, 9*Cin), tap-major blocks matching _TAPS order;
    # bf16 for the MXU (accumulation stays f32 in-kernel).
    def conv_w(w):                       # (O, I, 3, 3) -> (O, 9*I)
        return jnp.transpose(w, (0, 2, 3, 1)).reshape(C, 9 * C).astype(jnp.bfloat16)

    w1 = conv_w(params["w1"])
    w2 = conv_w(params["w2"])
    b1 = params["b1"].reshape(C, 1)
    b2 = params["b2"].reshape(C, 1)
    wd = params["wd"]                    # (Cr, C) f32
    bd = params["bd"].reshape(Cr, 1)
    wu = params["wu"]                    # (C, Cr) f32
    bu = params["bu"].reshape(C, 1)

    # Precompute the 9 border-validity masks (one per tap) in the flat HW layout.
    r = jnp.arange(HW, dtype=jnp.int32)
    row, col = r // W, r % W
    masks = jnp.stack([
        ((row + oy >= 0) & (row + oy < H) &
         (col + ox >= 0) & (col + ox < W)).astype(jnp.float32)
        for (oy, ox) in _TAPS
    ]).reshape(9, 1, HW)

    x_flat = x_nchw.reshape(N, C, HW)

    inv = lambda shape: pl.BlockSpec(shape, lambda n: (0,) * len(shape))

    kernel = functools.partial(_rcab_kernel, H=H, W=W, C=C)
    out_flat = pl.pallas_call(
        kernel,
        out_shape=jax.ShapeDtypeStruct((N, C, HW), x_nchw.dtype),
        grid_spec=pltpu.PrefetchScalarGridSpec(
            num_scalar_prefetch=0,
            grid=(N,),
            in_specs=[
                pl.BlockSpec((1, C, HW), lambda n: (n, 0, 0)),   # x (per-batch)
                inv((9, 1, HW)),      # border masks
                inv((C, 9 * C)),      # w1 (bf16)
                inv((C, 1)),          # b1
                inv((C, 9 * C)),      # w2 (bf16)
                inv((C, 1)),          # b2
                inv((Cr, C)),         # wd (1x1 conv down)
                inv((Cr, 1)),         # bd
                inv((C, Cr)),         # wu (1x1 conv up)
                inv((C, 1)),          # bu
            ],
            out_specs=pl.BlockSpec((1, C, HW), lambda n: (n, 0, 0)),
            scratch_shapes=[pltpu.VMEM((9 * C, HW), jnp.bfloat16)],  # im2col patches
        ),
        compiler_params=pltpu.CompilerParams(
            dimension_semantics=("parallel",),          # batch items independent
            vmem_limit_bytes=32 * 1024 * 1024),
    )(x_flat, masks, w1, b1, w2, b2, wd, bd, wu, bu)

    return out_flat.reshape(N, C, H, W)


def rcab_reference(x, p):
    """Pure-JAX NCHW reference mirroring the PyTorch module."""
    def conv3(v, w, b):
        return jax.lax.conv_general_dilated(
            v, w, window_strides=(1, 1), padding="SAME",
            dimension_numbers=("NCHW", "OIHW", "NCHW")) + b[None, :, None, None]
    y = jax.nn.relu(conv3(x, p["w1"], p["b1"]))
    y = conv3(y, p["w2"], p["b2"])
    pooled = y.mean(axis=(2, 3))                          # (N, C)
    h = jax.nn.relu(pooled @ p["wd"].T + p["bd"])
    s = jax.nn.sigmoid(h @ p["wu"].T + p["bu"])           # (N, C)
    return x + y * s[:, :, None, None]


def init_params(key, num_features, reduction):
    C = num_features
    Cr = C // reduction
    ks = jax.random.split(key, 8)
    sc3 = 1.0 / jnp.sqrt(9.0 * C)
    scd = 1.0 / jnp.sqrt(1.0 * C)
    scu = 1.0 / jnp.sqrt(1.0 * Cr)
    u = jax.random.uniform
    return {
        "w1": u(ks[0], (C, C, 3, 3), jnp.float32, -sc3, sc3),
        "b1": u(ks[1], (C,), jnp.float32, -sc3, sc3),
        "w2": u(ks[2], (C, C, 3, 3), jnp.float32, -sc3, sc3),
        "b2": u(ks[3], (C,), jnp.float32, -sc3, sc3),
        "wd": u(ks[4], (Cr, C), jnp.float32, -scd, scd),
        "bd": u(ks[5], (Cr,), jnp.float32, -scd, scd),
        "wu": u(ks[6], (C, Cr), jnp.float32, -scu, scu),
        "bu": u(ks[7], (C,), jnp.float32, -scu, scu),
    }


if __name__ == "__main__":
    # RCAB(num_features=32, reduction=4), x: (N=2, C=32, H=16, W=16) NCHW
    N, C, H, W = 2, 32, 16, 16
    reduction = 4

    key = jax.random.PRNGKey(0)
    kx, kp = jax.random.split(key)
    x = jax.random.normal(kx, (N, C, H, W), jnp.float32)
    params = init_params(kp, C, reduction)

    out = rcab_forward(x, params)
    out = jax.block_until_ready(out)

    ref = rcab_reference(x, params)
    assert out.shape == (N, C, H, W)
    # bf16 MXU inputs (f32 accumulation) -> relaxed tolerance vs the f32 reference.
    max_err = jnp.max(jnp.abs(out - ref))
    assert jnp.allclose(out, ref, atol=5e-2, rtol=5e-2), (
        f"mismatch vs JAX reference, max abs err={max_err}")

    print("KERNEL_OK")
</pallas_src>

<mosaic_0001>
module attributes {stable_mosaic.version = 11 : i64} {
  func.func @_rcab_kernel(%arg0: i32, %arg1: memref<1x32x256xf32, #tpu.memory_space<vmem>>, %arg2: memref<9x1x256xf32, #tpu.memory_space<vmem>>, %arg3: memref<32x288xbf16, #tpu.memory_space<vmem>>, %arg4: memref<32x1xf32, #tpu.memory_space<vmem>>, %arg5: memref<32x288xbf16, #tpu.memory_space<vmem>>, %arg6: memref<32x1xf32, #tpu.memory_space<vmem>>, %arg7: memref<8x32xf32, #tpu.memory_space<vmem>>, %arg8: memref<8x1xf32, #tpu.memory_space<vmem>>, %arg9: memref<32x8xf32, #tpu.memory_space<vmem>>, %arg10: memref<32x1xf32, #tpu.memory_space<vmem>>, %arg11: memref<1x32x256xf32, #tpu.memory_space<vmem>>, %arg12: memref<288x256xbf16, #tpu.memory_space<vmem>>) attributes {dimension_semantics = [#tpu.dimension_semantics<parallel>], iteration_bounds = array<i64: 2>, scalar_prefetch = 0 : i64, scratch_operands = 1 : i64, tpu.core_type = #tpu.core_type<tc>, window_params = [{transform_indices = @transform_0, window_bounds = array<i64: 1, 32, 256>}, {pipeline_mode = #tpu.pipeline_mode<synchronous>, transform_indices = @transform_1, window_bounds = array<i64: 9, 1, 256>}, {pipeline_mode = #tpu.pipeline_mode<synchronous>, transform_indices = @transform_2, window_bounds = array<i64: 32, 288>}, {pipeline_mode = #tpu.pipeline_mode<synchronous>, transform_indices = @transform_3, window_bounds = array<i64: 32, 1>}, {pipeline_mode = #tpu.pipeline_mode<synchronous>, transform_indices = @transform_4, window_bounds = array<i64: 32, 288>}, {pipeline_mode = #tpu.pipeline_mode<synchronous>, transform_indices = @transform_5, window_bounds = array<i64: 32, 1>}, {pipeline_mode = #tpu.pipeline_mode<synchronous>, transform_indices = @transform_6, window_bounds = array<i64: 8, 32>}, {pipeline_mode = #tpu.pipeline_mode<synchronous>, transform_indices = @transform_7, window_bounds = array<i64: 8, 1>}, {pipeline_mode = #tpu.pipeline_mode<synchronous>, transform_indices = @transform_8, window_bounds = array<i64: 32, 8>}, {pipeline_mode = #tpu.pipeline_mode<synchronous>, transform_indices = @transform_9, window_bounds = array<i64: 32, 1>}, {transform_indices = @transform_10, window_bounds = array<i64: 1, 32, 256>}]} {
    %c0 = arith.constant 0 : index
    %c0_0 = arith.constant 0 : index
    %c0_1 = arith.constant 0 : index
    %0 = vector.load %arg1[%c0, %c0_0, %c0_1] : memref<1x32x256xf32, #tpu.memory_space<vmem>>, vector<1x32x256xf32>
    %1 = vector.shape_cast %0 : vector<1x32x256xf32> to vector<32x256xf32>
    %c17_i32 = arith.constant 17 : i32
    %2 = tpu.dynamic_rotate %1 by %c17_i32 dim 1 : vector<32x256xf32>, i32 -> vector<32x256xf32>
    %c0_2 = arith.constant 0 : index
    %c0_3 = arith.constant 0 : index
    %c0_4 = arith.constant 0 : index
    %3 = vector.load %arg2[%c0_2, %c0_3, %c0_4] : memref<9x1x256xf32, #tpu.memory_space<vmem>>, vector<1x1x256xf32>
    %4 = vector.shape_cast %3 : vector<1x1x256xf32> to vector<1x256xf32>
    %5 = vector.broadcast %4 : vector<1x256xf32> to vector<32x256xf32>
    %6 = arith.mulf %2, %5 : vector<32x256xf32>
    %7 = arith.truncf %6 : vector<32x256xf32> to vector<32x256xbf16>
    %c0_5 = arith.constant 0 : index
    %c0_6 = arith.constant 0 : index
    %8 = vector.load %arg12[%c0_5, %c0_6] : memref<288x256xbf16, #tpu.memory_space<vmem>>, vector<32x256xbf16>
    tpu.vector_store %arg12[%c0_5, %c0_6], %7 {strides = array<i32>} : memref<288x256xbf16, #tpu.memory_space<vmem>>, vector<32x256xbf16>,
    %c16_i32 = arith.constant 16 : i32
    %9 = tpu.dynamic_rotate %1 by %c16_i32 dim 1 : vector<32x256xf32>, i32 -> vector<32x256xf32>
    %c1 = arith.constant 1 : index
    %c0_7 = arith.constant 0 : index
    %c0_8 = arith.constant 0 : index
    %10 = vector.load %arg2[%c1, %c0_7, %c0_8] : memref<9x1x256xf32, #tpu.memory_space<vmem>>, vector<1x1x256xf32>
    %11 = vector.shape_cast %10 : vector<1x1x256xf32> to vector<1x256xf32>
    %12 = vector.broadcast %11 : vector<1x256xf32> to vector<32x256xf32>
    %13 = arith.mulf %9, %12 : vector<32x256xf32>
    %14 = arith.truncf %13 : vector<32x256xf32> to vector<32x256xbf16>
    %c32 = arith.constant 32 : index
    %c0_9 = arith.constant 0 : index
    %15 = vector.load %arg12[%c32, %c0_9] : memref<288x256xbf16, #tpu.memory_space<vmem>>, vector<32x256xbf16>
    tpu.vector_store %arg12[%c32, %c0_9], %14 {strides = array<i32>} : memref<288x256xbf16, #tpu.memory_space<vmem>>, vector<32x256xbf16>,
    %c15_i32 = arith.constant 15 : i32
    %16 = tpu.dynamic_rotate %1 by %c15_i32 dim 1 : vector<32x256xf32>, i32 -> vector<32x256xf32>
    %c2 = arith.constant 2 : index
    %c0_10 = arith.constant 0 : index
    %c0_11 = arith.constant 0 : index
    %17 = vector.load %arg2[%c2, %c0_10, %c0_11] : memref<9x1x256xf32, #tpu.memory_space<vmem>>, vector<1x1x256xf32>
    %18 = vector.shape_cast %17 : vector<1x1x256xf32> to vector<1x256xf32>
    %19 = vector.broadcast %18 : vector<1x256xf32> to vector<32x256xf32>
    %20 = arith.mulf %16, %19 : vector<32x256xf32>
    %21 = arith.truncf %20 : vector<32x256xf32> to vector<32x256xbf16>
    %c64 = arith.constant 64 : index
    %c0_12 = arith.constant 0 : index
    %22 = vector.load %arg12[%c64, %c0_12] : memref<288x256xbf16, #tpu.memory_space<vmem>>, vector<32x256xbf16>
    tpu.vector_store %arg12[%c64, %c0_12], %21 {strides = array<i32>} : memref<288x256xbf16, #tpu.memory_space<vmem>>, vector<32x256xbf16>,
    %c1_i32 = arith.constant 1 : i32
    %23 = tpu.dynamic_rotate %1 by %c1_i32 dim 1 : vector<32x256xf32>, i32 -> vector<32x256xf32>
    %c3 = arith.constant 3 : index
    %c0_13 = arith.constant 0 : index
    %c0_14 = arith.constant 0 : index
    %24 = vector.load %arg2[%c3, %c0_13, %c0_14] : memref<9x1x256xf32, #tpu.memory_space<vmem>>, vector<1x1x256xf32>
    %25 = vector.shape_cast %24 : vector<1x1x256xf32> to vector<1x256xf32>
    %26 = vector.broadcast %25 : vector<1x256xf32> to vector<32x256xf32>
    %27 = arith.mulf %23, %26 : vector<32x256xf32>
    %28 = arith.truncf %27 : vector<32x256xf32> to vector<32x256xbf16>
    %c96 = arith.constant 96 : index
    %c0_15 = arith.constant 0 : index
    %29 = vector.load %arg12[%c96, %c0_15] : memref<288x256xbf16, #tpu.memory_space<vmem>>, vector<32x256xbf16>
    tpu.vector_store %arg12[%c96, %c0_15], %28 {strides = array<i32>} : memref<288x256xbf16, #tpu.memory_space<vmem>>, vector<32x256xbf16>,
    %30 = arith.truncf %1 : vector<32x256xf32> to vector<32x256xbf16>
    %c128 = arith.constant 128 : index
    %c0_16 = arith.constant 0 : index
    %31 = vector.load %arg12[%c128, %c0_16] : memref<288x256xbf16, #tpu.memory_space<vmem>>, vector<32x256xbf16>
    tpu.vector_store %arg12[%c128, %c0_16], %30 {strides = array<i32>} : memref<288x256xbf16, #tpu.memory_space<vmem>>, vector<32x256xbf16>,
    %c255_i32 = arith.constant 255 : i32
    %32 = tpu.dynamic_rotate %1 by %c255_i32 dim 1 : vector<32x256xf32>, i32 -> vector<32x256xf32>
    %c5 = arith.constant 5 : index
    %c0_17 = arith.constant 0 : index
    %c0_18 = arith.constant 0 : index
    %33 = vector.load %arg2[%c5, %c0_17, %c0_18] : memref<9x1x256xf32, #tpu.memory_space<vmem>>, vector<1x1x256xf32>
    %34 = vector.shape_cast %33 : vector<1x1x256xf32> to vector<1x256xf32>
    %35 = vector.broadcast %34 : vector<1x256xf32> to vector<32x256xf32>
    %36 = arith.mulf %32, %35 : vector<32x256xf32>
    %37 = arith.truncf %36 : vector<32x256xf32> to vector<32x256xbf16>
    %c160 = arith.constant 160 : index
    %c0_19 = arith.constant 0 : index
    %38 = vector.load %arg12[%c160, %c0_19] : memref<288x256xbf16, #tpu.memory_space<vmem>>, vector<32x256xbf16>
    tpu.vector_store %arg12[%c160, %c0_19], %37 {strides = array<i32>} : memref<288x256xbf16, #tpu.memory_space<vmem>>, vector<32x256xbf16>,
    %c241_i32 = arith.constant 241 : i32
    %39 = tpu.dynamic_rotate %1 by %c241_i32 dim 1 : vector<32x256xf32>, i32 -> vector<32x256xf32>
    %c6 = arith.constant 6 : index
    %c0_20 = arith.constant 0 : index
    %c0_21 = arith.constant 0 : index
    %40 = vector.load %arg2[%c6, %c0_20, %c0_21] : memref<9x1x256xf32, #tpu.memory_space<vmem>>, vector<1x1x256xf32>
    %41 = vector.shape_cast %40 : vector<1x1x256xf32> to vector<1x256xf32>
    %42 = vector.broadcast %41 : vector<1x256xf32> to vector<32x256xf32>
    %43 = arith.mulf %39, %42 : vector<32x256xf32>
    %44 = arith.truncf %43 : vector<32x256xf32> to vector<32x256xbf16>
    %c192 = arith.constant 192 : index
    %c0_22 = arith.constant 0 : index
    %45 = vector.load %arg12[%c192, %c0_22] : memref<288x256xbf16, #tpu.memory_space<vmem>>, vector<32x256xbf16>
    tpu.vector_store %arg12[%c192, %c0_22], %44 {strides = array<i32>} : memref<288x256xbf16, #tpu.memory_space<vmem>>, vector<32x256xbf16>,
    %c240_i32 = arith.constant 240 : i32
    %46 = tpu.dynamic_rotate %1 by %c240_i32 dim 1 : vector<32x256xf32>, i32 -> vector<32x256xf32>
    %c7 = arith.constant 7 : index
    %c0_23 = arith.constant 0 : index
    %c0_24 = arith.constant 0 : index
    %47 = vector.load %arg2[%c7, %c0_23, %c0_24] : memref<9x1x256xf32, #tpu.memory_space<vmem>>, vector<1x1x256xf32>
    %48 = vector.shape_cast %47 : vector<1x1x256xf32> to vector<1x256xf32>
    %49 = vector.broadcast %48 : vector<1x256xf32> to vector<32x256xf32>
    %50 = arith.mulf %46, %49 : vector<32x256xf32>
    %51 = arith.truncf %50 : vector<32x256xf32> to vector<32x256xbf16>
    %c224 = arith.constant 224 : index
    %c0_25 = arith.constant 0 : index
    %52 = vector.load %arg12[%c224, %c0_25] : memref<288x256xbf16, #tpu.memory_space<vmem>>, vector<32x256xbf16>
    tpu.vector_store %arg12[%c224, %c0_25], %51 {strides = array<i32>} : memref<288x256xbf16, #tpu.memory_space<vmem>>, vector<32x256xbf16>,
    %c239_i32 = arith.constant 239 : i32
    %53 = tpu.dynamic_rotate %1 by %c239_i32 dim 1 : vector<32x256xf32>, i32 -> vector<32x256xf32>
    %c8 = arith.constant 8 : index
    %c0_26 = arith.constant 0 : index
    %c0_27 = arith.constant 0 : index
    %54 = vector.load %arg2[%c8, %c0_26, %c0_27] : memref<9x1x256xf32, #tpu.memory_space<vmem>>, vector<1x1x256xf32>
    %55 = vector.shape_cast %54 : vector<1x1x256xf32> to vector<1x256xf32>
    %56 = vector.broadcast %55 : vector<1x256xf32> to vector<32x256xf32>
    %57 = arith.mulf %53, %56 : vector<32x256xf32>
    %58 = arith.truncf %57 : vector<32x256xf32> to vector<32x256xbf16>
    %c256 = arith.constant 256 : index
    %c0_28 = arith.constant 0 : index
    %59 = vector.load %arg12[%c256, %c0_28] : memref<288x256xbf16, #tpu.memory_space<vmem>>, vector<32x256xbf16>
    tpu.vector_store %arg12[%c256, %c0_28], %58 {strides = array<i32>} : memref<288x256xbf16, #tpu.memory_space<vmem>>, vector<32x256xbf16>,
    %c0_29 = arith.constant 0 : index
    %c0_30 = arith.constant 0 : index
    %60 = vector.load %arg3[%c0_29, %c0_30] : memref<32x288xbf16, #tpu.memory_space<vmem>>, vector<32x288xbf16>
    %c0_31 = arith.constant 0 : index
    %c0_32 = arith.constant 0 : index
    %61 = vector.load %arg12[%c0_31, %c0_32] : memref<288x256xbf16, #tpu.memory_space<vmem>>, vector<288x256xbf16>
    %cst = arith.constant dense<0.000000e+00> : vector<32x256xf32>
    %62 = tpu.matmul %60, %61, %cst {dimension_numbers = #tpu.dot_dimension_numbers<[1], [0], [0], [1], [0, 0, 1, 1], [], []>} : vector<32x288xbf16>, vector<288x256xbf16>, vector<32x256xf32> -> vector<32x256xf32>
    %c0_33 = arith.constant 0 : index
    %c0_34 = arith.constant 0 : index
    %63 = vector.load %arg4[%c0_33, %c0_34] : memref<32x1xf32, #tpu.memory_space<vmem>>, vector<32x1xf32>
    %64 = vector.broadcast %63 : vector<32x1xf32> to vector<32x256xf32>
    %65 = arith.addf %62, %64 : vector<32x256xf32>
    %cst_35 = arith.constant 0.000000e+00 : f32
    %66 = vector.broadcast %cst_35 : f32 to vector<32x256xf32>
    %67 = arith.maximumf %65, %66 : vector<32x256xf32>
    %c17_i32_36 = arith.constant 17 : i32
    %68 = tpu.dynamic_rotate %67 by %c17_i32_36 dim 1 : vector<32x256xf32>, i32 -> vector<32x256xf32>
    %c0_37 = arith.constant 0 : index
    %c0_38 = arith.constant 0 : index
    %c0_39 = arith.constant 0 : index
    %69 = vector.load %arg2[%c0_37, %c0_38, %c0_39] : memref<9x1x256xf32, #tpu.memory_space<vmem>>, vector<1x1x256xf32>
    %70 = vector.shape_cast %69 : vector<1x1x256xf32> to vector<1x256xf32>
    %71 = vector.broadcast %70 : vector<1x256xf32> to vector<32x256xf32>
    %72 = arith.mulf %68, %71 : vector<32x256xf32>
    %73 = arith.truncf %72 : vector<32x256xf32> to vector<32x256xbf16>
    %c0_40 = arith.constant 0 : index
    %c0_41 = arith.constant 0 : index
    %74 = vector.load %arg12[%c0_40, %c0_41] : memref<288x256xbf16, #tpu.memory_space<vmem>>, vector<32x256xbf16>
    tpu.vector_store %arg12[%c0_40, %c0_41], %73 {strides = array<i32>} : memref<288x256xbf16, #tpu.memory_space<vmem>>, vector<32x256xbf16>,
    %c16_i32_42 = arith.constant 16 : i32
    %75 = tpu.dynamic_rotate %67 by %c16_i32_42 dim 1 : vector<32x256xf32>, i32 -> vector<32x256xf32>
    %c1_43 = arith.constant 1 : index
    %c0_44 = arith.constant 0 : index
    %c0_45 = arith.constant 0 : index
    %76 = vector.load %arg2[%c1_43, %c0_44, %c0_45] : memref<9x1x256xf32, #tpu.memory_space<vmem>>, vector<1x1x256xf32>
    %77 = vector.shape_cast %76 : vector<1x1x256xf32> to vector<1x256xf32>
    %78 = vector.broadcast %77 : vector<1x256xf32> to vector<32x256xf32>
    %79 = arith.mulf %75, %78 : vector<32x256xf32>
    %80 = arith.truncf %79 : vector<32x256xf32> to vector<32x256xbf16>
    %c32_46 = arith.constant 32 : index
    %c0_47 = arith.constant 0 : index
    %81 = vector.load %arg12[%c32_46, %c0_47] : memref<288x256xbf16, #tpu.memory_space<vmem>>, vector<32x256xbf16>
    tpu.vector_store %arg12[%c32_46, %c0_47], %80 {strides = array<i32>} : memref<288x256xbf16, #tpu.memory_space<vmem>>, vector<32x256xbf16>,
    %c15_i32_48 = arith.constant 15 : i32
    %82 = tpu.dynamic_rotate %67 by %c15_i32_48 dim 1 : vector<32x256xf32>, i32 -> vector<32x256xf32>
    %c2_49 = arith.constant 2 : index
    %c0_50 = arith.constant 0 : index
    %c0_51 = arith.constant 0 : index
    %83 = vector.load %arg2[%c2_49, %c0_50, %c0_51] : memref<9x1x256xf32, #tpu.memory_space<vmem>>, vector<1x1x256xf32>
    %84 = vector.shape_cast %83 : vector<1x1x256xf32> to vector<1x256xf32>
    %85 = vector.broadcast %84 : vector<1x256xf32> to vector<32x256xf32>
    %86 = arith.mulf %82, %85 : vector<32x256xf32>
    %87 = arith.truncf %86 : vector<32x256xf32> to vector<32x256xbf16>
    %c64_52 = arith.constant 64 : index
    %c0_53 = arith.constant 0 : index
    %88 = vector.load %arg12[%c64_52, %c0_53] : memref<288x256xbf16, #tpu.memory_space<vmem>>, vector<32x256xbf16>
    tpu.vector_store %arg12[%c64_52, %c0_53], %87 {strides = array<i32>} : memref<288x256xbf16, #tpu.memory_space<vmem>>, vector<32x256xbf16>,
    %c1_i32_54 = arith.constant 1 : i32
    %89 = tpu.dynamic_rotate %67 by %c1_i32_54 dim 1 : vector<32x256xf32>, i32 -> vector<32x256xf32>
    %c3_55 = arith.constant 3 : index
    %c0_56 = arith.constant 0 : index
    %c0_57 = arith.constant 0 : index
    %90 = vector.load %arg2[%c3_55, %c0_56, %c0_57] : memref<9x1x256xf32, #tpu.memory_space<vmem>>, vector<1x1x256xf32>
    %91 = vector.shape_cast %90 : vector<1x1x256xf32> to vector<1x256xf32>
    %92 = vector.broadcast %91 : vector<1x256xf32> to vector<32x256xf32>
    %93 = arith.mulf %89, %92 : vector<32x256xf32>
    %94 = arith.truncf %93 : vector<32x256xf32> to vector<32x256xbf16>
    %c96_58 = arith.constant 96 : index
    %c0_59 = arith.constant 0 : index
    %95 = vector.load %arg12[%c96_58, %c0_59] : memref<288x256xbf16, #tpu.memory_space<vmem>>, vector<32x256xbf16>
    tpu.vector_store %arg12[%c96_58, %c0_59], %94 {strides = array<i32>} : memref<288x256xbf16, #tpu.memory_space<vmem>>, vector<32x256xbf16>,
    %96 = arith.truncf %67 : vector<32x256xf32> to vector<32x256xbf16>
    %c128_60 = arith.constant 128 : index
    %c0_61 = arith.constant 0 : index
    %97 = vector.load %arg12[%c128_60, %c0_61] : memref<288x256xbf16, #tpu.memory_space<vmem>>, vector<32x256xbf16>
    tpu.vector_store %arg12[%c128_60, %c0_61], %96 {strides = array<i32>} : memref<288x256xbf16, #tpu.memory_space<vmem>>, vector<32x256xbf16>,
    %c255_i32_62 = arith.constant 255 : i32
    %98 = tpu.dynamic_rotate %67 by %c255_i32_62 dim 1 : vector<32x256xf32>, i32 -> vector<32x256xf32>
    %c5_63 = arith.constant 5 : index
    %c0_64 = arith.constant 0 : index
    %c0_65 = arith.constant 0 : index
    %99 = vector.load %arg2[%c5_63, %c0_64, %c0_65] : memref<9x1x256xf32, #tpu.memory_space<vmem>>, vector<1x1x256xf32>
    %100 = vector.shape_cast %99 : vector<1x1x256xf32> to vector<1x256xf32>
    %101 = vector.broadcast %100 : vector<1x256xf32> to vector<32x256xf32>
    %102 = arith.mulf %98, %101 : vector<32x256xf32>
    %103 = arith.truncf %102 : vector<32x256xf32> to vector<32x256xbf16>
    %c160_66 = arith.constant 160 : index
    %c0_67 = arith.constant 0 : index
    %104 = vector.load %arg12[%c160_66, %c0_67] : memref<288x256xbf16, #tpu.memory_space<vmem>>, vector<32x256xbf16>
    tpu.vector_store %arg12[%c160_66, %c0_67], %103 {strides = array<i32>} : memref<288x256xbf16, #tpu.memory_space<vmem>>, vector<32x256xbf16>,
    %c241_i32_68 = arith.constant 241 : i32
    %105 = tpu.dynamic_rotate %67 by %c241_i32_68 dim 1 : vector<32x256xf32>, i32 -> vector<32x256xf32>
    %c6_69 = arith.constant 6 : index
    %c0_70 = arith.constant 0 : index
    %c0_71 = arith.constant 0 : index
    %106 = vector.load %arg2[%c6_69, %c0_70, %c0_71] : memref<9x1x256xf32, #tpu.memory_space<vmem>>, vector<1x1x256xf32>
    %107 = vector.shape_cast %106 : vector<1x1x256xf32> to vector<1x256xf32>
    %108 = vector.broadcast %107 : vector<1x256xf32> to vector<32x256xf32>
    %109 = arith.mulf %105, %108 : vector<32x256xf32>
    %110 = arith.truncf %109 : vector<32x256xf32> to vector<32x256xbf16>
    %c192_72 = arith.constant 192 : index
    %c0_73 = arith.constant 0 : index
    %111 = vector.load %arg12[%c192_72, %c0_73] : memref<288x256xbf16, #tpu.memory_space<vmem>>, vector<32x256xbf16>
    tpu.vector_store %arg12[%c192_72, %c0_73], %110 {strides = array<i32>} : memref<288x256xbf16, #tpu.memory_space<vmem>>, vector<32x256xbf16>,
    %c240_i32_74 = arith.constant 240 : i32
    %112 = tpu.dynamic_rotate %67 by %c240_i32_74 dim 1 : vector<32x256xf32>, i32 -> vector<32x256xf32>
    %c7_75 = arith.constant 7 : index
    %c0_76 = arith.constant 0 : index
    %c0_77 = arith.constant 0 : index
    %113 = vector.load %arg2[%c7_75, %c0_76, %c0_77] : memref<9x1x256xf32, #tpu.memory_space<vmem>>, vector<1x1x256xf32>
    %114 = vector.shape_cast %113 : vector<1x1x256xf32> to vector<1x256xf32>
    %115 = vector.broadcast %114 : vector<1x256xf32> to vector<32x256xf32>
    %116 = arith.mulf %112, %115 : vector<32x256xf32>
    %117 = arith.truncf %116 : vector<32x256xf32> to vector<32x256xbf16>
    %c224_78 = arith.constant 224 : index
    %c0_79 = arith.constant 0 : index
    %118 = vector.load %arg12[%c224_78, %c0_79] : memref<288x256xbf16, #tpu.memory_space<vmem>>, vector<32x256xbf16>
    tpu.vector_store %arg12[%c224_78, %c0_79], %117 {strides = array<i32>} : memref<288x256xbf16, #tpu.memory_space<vmem>>, vector<32x256xbf16>,
    %c239_i32_80 = arith.constant 239 : i32
    %119 = tpu.dynamic_rotate %67 by %c239_i32_80 dim 1 : vector<32x256xf32>, i32 -> vector<32x256xf32>
    %c8_81 = arith.constant 8 : index
    %c0_82 = arith.constant 0 : index
    %c0_83 = arith.constant 0 : index
    %120 = vector.load %arg2[%c8_81, %c0_82, %c0_83] : memref<9x1x256xf32, #tpu.memory_space<vmem>>, vector<1x1x256xf32>
    %121 = vector.shape_cast %120 : vector<1x1x256xf32> to vector<1x256xf32>
    %122 = vector.broadcast %121 : vector<1x256xf32> to vector<32x256xf32>
    %123 = arith.mulf %119, %122 : vector<32x256xf32>
    %124 = arith.truncf %123 : vector<32x256xf32> to vector<32x256xbf16>
    %c256_84 = arith.constant 256 : index
    %c0_85 = arith.constant 0 : index
    %125 = vector.load %arg12[%c256_84, %c0_85] : memref<288x256xbf16, #tpu.memory_space<vmem>>, vector<32x256xbf16>
    tpu.vector_store %arg12[%c256_84, %c0_85], %124 {strides = array<i32>} : memref<288x256xbf16, #tpu.memory_space<vmem>>, vector<32x256xbf16>,
    %c0_86 = arith.constant 0 : index
    %c0_87 = arith.constant 0 : index
    %126 = vector.load %arg5[%c0_86, %c0_87] : memref<32x288xbf16, #tpu.memory_space<vmem>>, vector<32x288xbf16>
    %c0_88 = arith.constant 0 : index
    %c0_89 = arith.constant 0 : index
    %127 = vector.load %arg12[%c0_88, %c0_89] : memref<288x256xbf16, #tpu.memory_space<vmem>>, vector<288x256xbf16>
    %cst_90 = arith.constant dense<0.000000e+00> : vector<32x256xf32>
    %128 = tpu.matmul %126, %127, %cst_90 {dimension_numbers = #tpu.dot_dimension_numbers<[1], [0], [0], [1], [0, 0, 1, 1], [], []>} : vector<32x288xbf16>, vector<288x256xbf16>, vector<32x256xf32> -> vector<32x256xf32>
    %c0_91 = arith.constant 0 : index
    %c0_92 = arith.constant 0 : index
    %129 = vector.load %arg6[%c0_91, %c0_92] : memref<32x1xf32, #tpu.memory_space<vmem>>, vector<32x1xf32>
    %130 = vector.broadcast %129 : vector<32x1xf32> to vector<32x256xf32>
    %131 = arith.addf %128, %130 : vector<32x256xf32>
    %cst_93 = arith.constant dense<0.000000e+00> : vector<32xf32>
    %132 = vector.multi_reduction <add>, %131, %cst_93 [1] : vector<32x256xf32> to vector<32xf32>
    %133 = vector.shape_cast %132 : vector<32xf32> to vector<32x1xf32>
    %cst_94 = arith.constant 2.560000e+02 : f32
    %134 = vector.broadcast %cst_94 : f32 to vector<32x1xf32>
    %135 = arith.divf %133, %134 : vector<32x1xf32>
    %c0_95 = arith.constant 0 : index
    %c0_96 = arith.constant 0 : index
    %136 = vector.load %arg7[%c0_95, %c0_96] : memref<8x32xf32, #tpu.memory_space<vmem>>, vector<8x32xf32>
    %cst_97 = arith.constant dense<0.000000e+00> : vector<8x1xf32>
    %137 = tpu.matmul %136, %135, %cst_97 {dimension_numbers = #tpu.dot_dimension_numbers<[1], [0], [0], [1], [0, 0, 1, 1], [], []>} : vector<8x32xf32>, vector<32x1xf32>, vector<8x1xf32> -> vector<8x1xf32>
    %c0_98 = arith.constant 0 : index
    %c0_99 = arith.constant 0 : index
    %138 = vector.load %arg8[%c0_98, %c0_99] : memref<8x1xf32, #tpu.memory_space<vmem>>, vector<8x1xf32>
    %139 = arith.addf %137, %138 : vector<8x1xf32>
    %cst_100 = arith.constant 0.000000e+00 : f32
    %140 = vector.broadcast %cst_100 : f32 to vector<8x1xf32>
    %141 = arith.maximumf %139, %140 : vector<8x1xf32>
    %c0_101 = arith.constant 0 : index
    %c0_102 = arith.constant 0 : index
    %142 = vector.load %arg9[%c0_101, %c0_102] : memref<32x8xf32, #tpu.memory_space<vmem>>, vector<32x8xf32>
    %cst_103 = arith.constant dense<0.000000e+00> : vector<32x1xf32>
    %143 = tpu.matmul %142, %141, %cst_103 {dimension_numbers = #tpu.dot_dimension_numbers<[1], [0], [0], [1], [0, 0, 1, 1], [], []>} : vector<32x8xf32>, vector<8x1xf32>, vector<32x1xf32> -> vector<32x1xf32>
    %c0_104 = arith.constant 0 : index
    %c0_105 = arith.constant 0 : index
    %144 = vector.load %arg10[%c0_104, %c0_105] : memref<32x1xf32, #tpu.memory_space<vmem>>, vector<32x1xf32>
    %145 = arith.addf %143, %144 : vector<32x1xf32>
    %146 = arith.negf %145 : vector<32x1xf32>
    %147 = math.exp %146 : vector<32x1xf32>
    %cst_106 = arith.constant 1.000000e+00 : f32
    %148 = vector.broadcast %cst_106 : f32 to vector<32x1xf32>
    %149 = arith.addf %148, %147 : vector<32x1xf32>
    %150 = arith.divf %148, %149 : vector<32x1xf32>
    %151 = vector.broadcast %150 : vector<32x1xf32> to vector<32x256xf32>
    %152 = arith.mulf %131, %151 : vector<32x256xf32>
    %153 = arith.addf %1, %152 : vector<32x256xf32>
    %c0_107 = arith.constant 0 : index
    %c0_108 = arith.constant 0 : index
    %c0_109 = arith.constant 0 : index
    %154 = vector.load %arg11[%c0_107, %c0_108, %c0_109] : memref<1x32x256xf32, #tpu.memory_space<vmem>>, vector<1x32x256xf32>
    %155 = vector.shape_cast %154 : vector<1x32x256xf32> to vector<32x256xf32>
    %156 = vector.shape_cast %153 : vector<32x256xf32> to vector<1x32x256xf32>
    tpu.vector_store %arg11[%c0_107, %c0_108, %c0_109], %156 {strides = array<i32>} : memref<1x32x256xf32, #tpu.memory_space<vmem>>, vector<1x32x256xf32>,
    return
  }
  func.func @transform_0(%arg0: i32) -> (i32, i32, i32) {
    %c0_i32 = arith.constant 0 : i32
    %c0_i32_0 = arith.constant 0 : i32
    %c0_i32_1 = arith.constant 0 : i32
    return %arg0, %c0_i32, %c0_i32_0 : i32, i32, i32
  }
  func.func @transform_1(%arg0: i32) -> (i32, i32, i32) {
    %c0_i32 = arith.constant 0 : i32
    %c0_i32_0 = arith.constant 0 : i32
    %c0_i32_1 = arith.constant 0 : i32
    %c0_i32_2 = arith.constant 0 : i32
    return %c0_i32, %c0_i32_0, %c0_i32_1 : i32, i32, i32
  }
  func.func @transform_2(%arg0: i32) -> (i32, i32) {
    %c0_i32 = arith.constant 0 : i32
    %c0_i32_0 = arith.constant 0 : i32
    %c0_i32_1 = arith.constant 0 : i32
    return %c0_i32, %c0_i32_0 : i32, i32
  }
  func.func @transform_3(%arg0: i32) -> (i32, i32) {
    %c0_i32 = arith.constant 0 : i32
    %c0_i32_0 = arith.constant 0 : i32
    %c0_i32_1 = arith.constant 0 : i32
    return %c0_i32, %c0_i32_0 : i32, i32
  }
  func.func @transform_4(%arg0: i32) -> (i32, i32) {
    %c0_i32 = arith.constant 0 : i32
    %c0_i32_0 = arith.constant 0 : i32
    %c0_i32_1 = arith.constant 0 : i32
    return %c0_i32, %c0_i32_0 : i32, i32
  }
  func.func @transform_5(%arg0: i32) -> (i32, i32) {
    %c0_i32 = arith.constant 0 : i32
    %c0_i32_0 = arith.constant 0 : i32
    %c0_i32_1 = arith.constant 0 : i32
    return %c0_i32, %c0_i32_0 : i32, i32
  }
  func.func @transform_6(%arg0: i32) -> (i32, i32) {
    %c0_i32 = arith.constant 0 : i32
    %c0_i32_0 = arith.constant 0 : i32
    %c0_i32_1 = arith.constant 0 : i32
    return %c0_i32, %c0_i32_0 : i32, i32
  }
  func.func @transform_7(%arg0: i32) -> (i32, i32) {
    %c0_i32 = arith.constant 0 : i32
    %c0_i32_0 = arith.constant 0 : i32
    %c0_i32_1 = arith.constant 0 : i32
    return %c0_i32, %c0_i32_0 : i32, i32
  }
  func.func @transform_8(%arg0: i32) -> (i32, i32) {
    %c0_i32 = arith.constant 0 : i32
    %c0_i32_0 = arith.constant 0 : i32
    %c0_i32_1 = arith.constant 0 : i32
    return %c0_i32, %c0_i32_0 : i32, i32
  }
  func.func @transform_9(%arg0: i32) -> (i32, i32) {
    %c0_i32 = arith.constant 0 : i32
    %c0_i32_0 = arith.constant 0 : i32
    %c0_i32_1 = arith.constant 0 : i32
    return %c0_i32, %c0_i32_0 : i32, i32
  }
  func.func @transform_10(%arg0: i32) -> (i32, i32, i32) {
    %c0_i32 = arith.constant 0 : i32
    %c0_i32_0 = arith.constant 0 : i32
    %c0_i32_1 = arith.constant 0 : i32
    return %arg0, %c0_i32, %c0_i32_0 : i32, i32, i32
  }
}

</mosaic_0001>

<bundles_post_ra>
// kernel: tpu_custom_call.1
= control target key start
LH: loop header
LB: loop body
LE: loop exit
PB: predicated region body
PF: predicated region fallthrough
CT: control target
= control target key end

     0   :  { %15 = vsyncpa [#allocation4], 0  ;;  %s4205_s0 = inlined_call_operand.hbm [shape: f32[2,32,256], index: 0, kind: input, shape index: {}]   ;;  %s4206_s1 = inlined_call_operand.vmem [shape: f32[9,1,256], index: 1, kind: input, shape index: {}]   ;;  %s4207_s2 = inlined_call_operand.vmem [shape: bf16[32,288], index: 2, kind: input, shape index: {}]   ;;  %s4208_s3 = inlined_call_operand.vmem [shape: f32[32,1], index: 3, kind: input, shape index: {}]   ;;  %s4209_s4 = inlined_call_operand.vmem [shape: bf16[32,288], index: 4, kind: input, shape index: {}]   ;;  %s4210_s5 = inlined_call_operand.vmem [shape: f32[32,1], index: 5, kind: input, shape index: {}]   ;;  %s4211_s6 = inlined_call_operand.vmem [shape: f32[8,32], index: 6, kind: input, shape index: {}]   ;;  %s4212_s7 = inlined_call_operand.vmem [shape: f32[8,1], index: 7, kind: input, shape index: {}]   ;;  %s4213_s8 = inlined_call_operand.vmem [shape: f32[32,8], index: 8, kind: input, shape index: {}]   ;;  %s4214_s9 = inlined_call_operand.vmem [shape: f32[32,1], index: 9, kind: input, shape index: {}]   ;;  %s4215_s10 = inlined_call_operand.hbm [shape: f32[2,32,256], index: 10, kind: output, shape index: {}]  }
   0x1   :  { %17 = vsyncpa [#allocation4 + $0x1], 0 }
   0x2   :  { %18 = vsyncpa [#allocation5], 0 }
   0x3   :  { %20 = vsyncpa [#allocation5 + $0x1], 0  ;;  %s2992_s13 = smov 0   ;;  %s2994_s14 = smov 0  }
   0x4   :  { %s2996_s15 = smov 0   ;;  %s2998_s16 = smov 0  }
   0x5 LB: > { %4227 = sst [smem:[#allocation9_spill]] %s2918_s15  ;;  %s3013_s17 = sadd.s32 4294967295, %s2922_s16   ;;  %s2922_s16 = sphi %s2998_s16, %s4242_s16   ;;  %s2918_s15 = sphi %s2996_s15, %s4244_s15   ;;  %s2914_s14 = sphi %s2994_s14, %s4246_s14   ;;  %s2910_s13 = sphi %s2992_s13, %s4245_s13  }
   0x6   : > { %s2271_s18 = sadd.s32 4294967294, %s2922_s16   ;;  %s3017_s19 = sadd.s32 1, %s2922_s16  }
   0x7   : > { %4228 = sst [smem:[#allocation10_spill]] %s3017_s19  ;;  %s33_s20 = sadd.s32 1, %s2918_s15 }
   0x8   : > { %s30_s21 = ssub.s32 %s2922_s16, %s3017_s19  ;;  %p40_p0 = scmp.ne.s32.totalorder %s2918_s15, %s2914_s14 }
   0x9   : > { %p31_p1 = scmp.eq.s32.totalorder %s30_s21, 0  ;;  %p41_p2 = scmp.eq.s32.totalorder %s2922_s16, 0 }
   0xa   : > { %p46_p3 = scmp.ne.s32.totalorder %s2914_s14, %s2910_s13  ;;  %p47_p4 = scmp.eq.s32.totalorder %s3013_s17, 0 }
   0xb   : > { %s3029_s22 = scalar_select %p31_p1, %s2918_s15, %s33_s20  }
   0xc   : > { %p3031_p5 = por %p41_p2, %p40_p0  ;;  %p3035_p6 = por %p47_p4, %p46_p3 }
   0xd   : > { %4229 = sst [smem:[#allocation11_spill]] %s3029_s22  ;;  %p259_p7 = scmp.eq.s32.totalorder %s3013_s17, 1 }
   0xe   : > { %p265_p8 = scmp.eq.s32.totalorder %s2271_s18, 1  ;;  %p2750_p10 = scmp.lt.s32.totalorder %s2922_s16, 2 }
   0xf   : > { %p3042_p11 = por %p259_p7, %p40_p0  ;;  %s312_s27 = sand.u32 1, %s2918_s15  }
  0x10   : > { %p3046_p12 = por %p265_p8, %p46_p3  ;;  %s2652_s28 = sshll.u32 %s2922_s16, 6 }
  0x11   : > { %s2274_s29 = sshll.u32 %s312_s27, 6  ;;  %s321_s12 = scalar_lea.hbm %s4205_s0, %s2652_s28 }
  0x12   : > { %s4233_s26 = scalar_select %p3046_p12, 1, 0 }
  0x13   : > { %s322_s20 = sshll.u32 %s321_s12, 4  ;;  %s316_s18 = scalar_lea.vmem [#allocation3], %s2274_s29  ;;  %s323_s20 = int_to_ptr.hbm [resolvable:$true] %s322_s20 }
  0x14   : > { %4234 = sst [smem:[#allocation12_spill]] %s4233_s26  ;;  %s324_s21 = sshll.u32 %s316_s18, 4  ;;  %s325_s21 = int_to_ptr.vmem [resolvable:$true] %s324_s21 }
  0x15   : > { %p3057_p13 = pnand %p2750_p10, %p3031_p5  ;;  %p2277_p0 = scmp.ge.s32.totalorder %s2922_s16, 1 }
  0x16   : > { %p332_p1 = scmp.lt.s32.totalorder %s2922_s16, 3  ;;  %s313_s15 = scalar_lea.sflag [#allocation4], %s312_s27 }
  0x17   : > { %s2826_s19 = sshra.s32 %s323_s20, 4  ;;  %p2830_p3 = pneg %p3057_p13  ;;  %s2827_s19 = int_to_ptr.hbm [resolvable:$true] %s2826_s19 }
  0x18   : > { %s2828_s26 = scalar_lea.hbm %s2827_s19, 64  ;;  %s2833_s23 = scalar_lea.hbm %s4205_s0, 128 }
  0x19   : > { %p2829_p2 = scmp.ne.s32.totalorder %s2827_s19, %s2828_s26  ;;  %p2834_p5 = scmp.lt.s32.totalorder %s2827_s19, %s4205_s0 }
  0x1a   : > { %p2835_p8 = scmp.lt.s32.totalorder %s2833_s23, %s2828_s26 }
  0x1b   : > { %p2831_p4 = pnand %p2830_p3, %p2829_p2 }
  0x1c   : > { %p2836_p10 = por %p2835_p8, %p2834_p5 }
  0x1d   : > { %p2832_p7 = pneg %p2831_p4 }
  0x1f   : > { %p2837_p9 = pnand %p2836_p10, %p2832_p7 }
  0x21   : > { %2840 = shalt.err (!%p2837_p9)
}
  0x22   : > { %s2924_s27 = smov 256   ;;  %s2925_s12 = smov 16  }
  0x23   : > { %2745 = dma.hbm_to_vmem [thread:$0]  (!%p3057_p13), %s323_s20, 1024, %s325_s21, %s313_s15, %s2924_s27, %s2924_s27, %s2925_s12  }
  0x24   : > { %p333_p2 = pnand %p2277_p0, %p332_p1 }
  0x25   : > { %s3078_s18 = sand.u32 (!%p333_p2), 1, %s2914_s14  }
  0x26   : > { %336 = sbr.rel (%p333_p2) target bundleno = 1520 (0x5f0), region = 60  ;;  %s4220_s19 = sshll.u32 (!%p333_p2), %s3078_s18, 6 }
  0x27   : > { %s339_s26 = scalar_lea.sflag (!%p333_p2), [#allocation4], %s3078_s18  ;;  %s3084_s28 = scalar_lea.vmem (!%p333_p2), [#allocation3], %s4220_s19 }
  0x2b   : > { %2901 = dma.done.wait (%p3035_p6), %s339_s26, 1024  }
  0x2c   : > { %2903 = vsyncadd (%p3035_p6), %s339_s26, 4294966272  ;;  %v3091_v0 = vld [vmem:[%s3084_s28 + $0x28] sm:$0xff]  ;;  %v3094_v1 = vld [vmem:[%s3084_s28 + $0x20] sm:$0xff]  ;;  %s2926_s15 = smov 1   ;;  %s2927_s22 = smov 15   ;;  %v405_v10 = vlaneseq  ;;  %vm1060_vm7 = vcmask 261120  }
  0x2d   : > { %546 = vrot.lane.b32.xlu1 %v3091_v0, %s2926_s15  ;;  %538 = vrot.lane.b32.xlu0 %v3094_v1, %s2926_s15  ;;  %v3101_v2 = vld [vmem:[%s3084_s28] sm:$0xff]  ;;  %v3106_v3 = vld [vmem:[%s3084_s28 + $0x38] sm:$0xff]  ;;  %s4225_s24 = smov 16   ;;  %s4221_s20 = smov 111   ;;  %vm2020_vm10 = vcmask 64512  }
  0x2e   : > { %534 = vrot.lane.b32.xlu2 %v3101_v2, %s2926_s15  ;;  %v3109_v4 = vld [vmem:[%s3084_s28 + $0x30] sm:$0xff]  ;;  %v3121_v6 = vld [vmem:[%s3084_s28 + $0x18] sm:$0xff]  ;;  %v3124_v7 = vld [vmem:[%s3084_s28 + $0x8] sm:$0xff]  ;;  %s4223_s21 = smov 17   ;;  %s2931_s29 = smov 112   ;;  %v3198_v11 = vand.u32 127, %v405_v10 }
  0x2f   : > { %v3112_v5 = vld [vmem:[%s3084_s28 + $0x10] sm:$0xff]  ;;  %v2282_v13 = vld [vmem:[%s4206_s1 + $0x6] sm:$0x3]  ;;  %s2932_s11 = smov 113   ;;  %v2281_v43 = vld [vmem:[%s4206_s1 + $0x4] sm:$0x3] }
  0x30   : > { %vm550_vm0 = vcmp.lt.s32.totalorder %v3198_v11, 1  ;;  %v562_v14 = vperm.slane %v2282_v13, 0  ;;  %v563_v15 = vperm.slane %v2282_v13, 1  ;;  %vm502_vm1 = vcmp.lt.s32.totalorder %v3198_v11, 15  ;;  %s2933_s26 = smov 127   ;;  %s4237_s19 = smov 17  }
  0x31   : > { %v514_v52 = vperm.slane %v2281_v43, 0  ;;  %v515_v53 = vperm.slane %v2281_v43, 1  ;;  %vm454_vm2 = vcmp.lt.s32.totalorder %v3198_v11, 16  ;;  %vm750_vm3 = vcmp.lt.s32.totalorder %v3198_v11, 111  ;;  %s4239_s30 = sshll.u32 %s3078_s18, 6 }
  0x32   : > { %vm407_vm4 = vcmp.lt.s32.totalorder %v3198_v11, 17  ;;  %vm702_vm5 = vcmp.lt.s32.totalorder %v3198_v11, 112  ;;  %vm654_vm6 = vcmp.lt.s32.totalorder %v3198_v11, 113  ;;  %vm606_vm8 = vcmp.lt.s32.totalorder %v3198_v11, 127  ;;  %s4148_s27 = scalar_lea.vmem [#allocation6], %s4239_s30  ;;  %s2876_s30 = scalar_lea.hbm %s4215_s10, 128 }
  0x35   : > { %548 = vrot.lane.b32.xlu1 %v3106_v3, %s2926_s15  ;;  %540 = vrot.lane.b32.xlu0 %v3109_v4, %s2926_s15 }
  0x36   : > { %536 = vrot.lane.b32.xlu2 %v3112_v5, %s2926_s15 }
  0x3d   : > { %544 = vrot.lane.b32.xlu1 %v3121_v6, %s2926_s15  ;;  %542 = vrot.lane.b32.xlu0 %v3124_v7, %s2926_s15 }
  0x3e   : > { %490 = vrot.lane.b32.xlu2 %v3094_v1, %s2927_s22 }
  0x45   : > { %498 = vrot.lane.b32.xlu1 %v3091_v0, %s2927_s22  ;;  %492 = vrot.lane.b32.xlu0 %v3109_v4, %s2927_s22 }
  0x46   : > { %500 = vrot.lane.b32.xlu2 %v3106_v3, %s2927_s22 }
  0x4d   : > { %488 = vrot.lane.b32.xlu1 %v3112_v5, %s2927_s22  ;;  %486 = vrot.lane.b32.xlu0 %v3101_v2, %s2927_s22 }
  0x4e   : > { %494 = vrot.lane.b32.xlu2 %v3124_v7, %s2927_s22 }
  0x55   : > { %442 = vrot.lane.b32.xlu1 %v3094_v1, %s4225_s24  ;;  %496 = vrot.lane.b32.xlu0 %v3121_v6, %s2927_s22 }
  0x56   : > { %444 = vrot.lane.b32.xlu2 %v3109_v4, %s4225_s24 }
  0x5d   : > { %452 = vrot.lane.b32.xlu1 %v3106_v3, %s4225_s24  ;;  %450 = vrot.lane.b32.xlu0 %v3091_v0, %s4225_s24 }
  0x5e   : > { %738 = vrot.lane.b32.xlu2 %v3094_v1, %s4221_s20 }
  0x65   : > { %746 = vrot.lane.b32.xlu1 %v3091_v0, %s4221_s20  ;;  %740 = vrot.lane.b32.xlu0 %v3109_v4, %s4221_s20 }
  0x66   : > { %748 = vrot.lane.b32.xlu2 %v3106_v3, %s4221_s20 }
  0x6d   : > { %440 = vrot.lane.b32.xlu1 %v3112_v5, %s4225_s24  ;;  %438 = vrot.lane.b32.xlu0 %v3101_v2, %s4225_s24 }
  0x6e   : > { %446 = vrot.lane.b32.xlu2 %v3124_v7, %s4225_s24 }
  0x75   : > { %734 = vrot.lane.b32.xlu1 %v3101_v2, %s4221_s20  ;;  %448 = vrot.lane.b32.xlu0 %v3121_v6, %s4225_s24  ;;  %s4236_s24 = smov 16  }
  0x76   : > { %736 = vrot.lane.b32.xlu2 %v3112_v5, %s4221_s20 }
  0x7d   : > { %744 = vrot.lane.b32.xlu1 %v3121_v6, %s4221_s20  ;;  %742 = vrot.lane.b32.xlu0 %v3124_v7, %s4221_s20 }
  0x7e   : > { %393 = vrot.lane.b32.xlu2 %v3094_v1, %s4223_s21 }
  0x85   : > { %401 = vrot.lane.b32.xlu1 %v3091_v0, %s4223_s21  ;;  %395 = vrot.lane.b32.xlu0 %v3109_v4, %s4223_s21 }
  0x86   : > { %403 = vrot.lane.b32.xlu2 %v3106_v3, %s4223_s21 }
  0x88   : > { %v535_v8 = vpop.permute.xlu2 %534 }
  0x8d   : > { %692 = vrot.lane.b32.xlu1 %v3109_v4, %s2931_s29  ;;  %690 = vrot.lane.b32.xlu0 %v3094_v1, %s2931_s29 }
  0x8e   : > { %698 = vrot.lane.b32.xlu2 %v3091_v0, %s2931_s29 }
  0x90   : > { %v537_v9 = vpop.permute.xlu2 %536 }
  0x95   : > { %389 = vrot.lane.b32.xlu1 %v3101_v2, %s4223_s21  ;;  %700 = vrot.lane.b32.xlu0 %v3106_v3, %s2931_s29 }
  0x96   : > { %391 = vrot.lane.b32.xlu2 %v3112_v5, %s4223_s21 }
  0x98   : > { %v3200_v12 = vpop.permute.xlu2 %490 }
  0x9d   : > { %399 = vrot.lane.b32.xlu1 %v3121_v6, %s4223_s21  ;;  %397 = vrot.lane.b32.xlu0 %v3124_v7, %s4223_s21 }
  0x9e   : > { %686 = vrot.lane.b32.xlu2 %v3101_v2, %s2931_s29 }
  0x9f   : > { %v547_v16 = vpop.permute.xlu1 %546  ;;  %v539_v17 = vpop.permute.xlu0 %538 }
  0xa0   : > { %v553_v18 = vsel %vm550_vm0, %v539_v17, %v547_v16  ;;  %v557_v19 = vsel %vm550_vm0, %v547_v16, %v539_v17  ;;  %v501_v22 = vpop.permute.xlu2 %500 }
  0xa1   : > { %v570_v20 = vmul.f32 %v562_v14, %v557_v19  ;;  %v571_v21 = vmul.f32 %v563_v15, %v553_v18 }
  0xa3   : > { %v576_v23 = vpack.c.bf16 %v571_v21, %v570_v20 }
  0xa5   : > { %580 = vst [vmem:[#allocation2 + $0x70] sm:$0xff] %v576_v23  ;;  %694 = vrot.lane.b32.xlu1 %v3124_v7, %s2931_s29  ;;  %688 = vrot.lane.b32.xlu0 %v3112_v5, %s2931_s29 }
  0xa6   : > { %696 = vrot.lane.b32.xlu2 %v3121_v6, %s2931_s29 }
  0xa7   : > { %v549_v24 = vpop.permute.xlu1 %548  ;;  %v541_v25 = vpop.permute.xlu0 %540 }
  0xa8   : > { %v554_v26 = vsel %vm550_vm0, %v541_v25, %v549_v24  ;;  %v558_v27 = vsel %vm550_vm0, %v549_v24, %v541_v25  ;;  %v3226_v30 = vpop.permute.xlu2 %494 }
  0xa9   : > { %v572_v28 = vmul.f32 %v562_v14, %v558_v27  ;;  %v573_v29 = vmul.f32 %v563_v15, %v554_v26 }
  0xab   : > { %v577_v31 = vpack.c.bf16 %v573_v29, %v572_v28 }
  0xac   : > { %v2369_v46 = vld [vmem:[#allocation2 + $0x70] sm:$0xf]  ;;  %v2673_v48 = vld [vmem:[#allocation2 + $0x74] sm:$0xf] }
  0xad   : > { %581 = vst [vmem:[#allocation2 + $0x78] sm:$0xff] %v577_v31  ;;  %644 = vrot.lane.b32.xlu1 %v3109_v4, %s2932_s11  ;;  %642 = vrot.lane.b32.xlu0 %v3094_v1, %s2932_s11 }
  0xae   : > { %650 = vrot.lane.b32.xlu2 %v3091_v0, %s2932_s11 }
  0xaf   : > { %v545_v32 = vpop.permute.xlu1 %544  ;;  %v543_v33 = vpop.permute.xlu0 %542 }
  0xb0   : > { %v552_v34 = vsel %vm550_vm0, %v537_v9, %v545_v32  ;;  %v556_v35 = vsel %vm550_vm0, %v545_v32, %v537_v9  ;;  %v551_v36 = vsel %vm550_vm0, %v535_v8, %v543_v33  ;;  %v555_v37 = vsel %vm550_vm0, %v543_v33, %v535_v8  ;;  %v3242_v42 = vpop.permute.xlu2 %444 }
  0xb1   : > { %v568_v38 = vmul.f32 %v562_v14, %v556_v35  ;;  %v569_v39 = vmul.f32 %v563_v15, %v552_v34  ;;  %v566_v40 = vmul.f32 %v562_v14, %v555_v37  ;;  %v567_v41 = vmul.f32 %v563_v15, %v551_v36 }
  0xb3   : > { %v575_v44 = vpack.c.bf16 %v569_v39, %v568_v38  ;;  %v574_v45 = vpack.c.bf16 %v567_v41, %v566_v40  ;;  %v2280_v39 = vld [vmem:[%s4206_s1 + $0x2] sm:$0x3] }
  0xb4   : > { %v2674_v47 = vld [vmem:[#allocation2 + $0x74] sm:$0xf0]  ;;  %v2371_v49 = vld [vmem:[#allocation2 + $0x78] sm:$0xf0]  ;;  %v3298_v41 = vperm.slane %v2280_v39, 0  ;;  %v3300_v43 = vperm.slane %v2280_v39, 1 }
  0xb5   : > { %579 = vst [vmem:[#allocation2 + $0x68] sm:$0xff] %v575_v44  ;;  %638 = vrot.lane.b32.xlu1 %v3101_v2, %s2932_s11  ;;  %652 = vrot.lane.b32.xlu0 %v3106_v3, %s2932_s11  ;;  %v2370_v50 = vor.u32 %v2674_v47, %v2369_v46  ;;  %v2374_v51 = vor.u32 %v2673_v48, %v2371_v49 }
  0xb6   : > { %578 = vst [vmem:[#allocation2 + $0x60] sm:$0xff] %v574_v45  ;;  %640 = vrot.lane.b32.xlu2 %v3112_v5, %s2932_s11 }
  0xb7   : > { %1067 = vmatpush.bf16.msra.mxu0 %v2370_v50  ;;  %1124 = vmatpush.bf16.msra.mxu3 %v2374_v51  ;;  %v499_v54 = vpop.permute.xlu1 %498  ;;  %v493_v55 = vpop.permute.xlu0 %492 }
  0xb8   : > { %v505_v56 = vsel %vm502_vm1, %v3200_v12, %v499_v54  ;;  %v509_v57 = vsel %vm502_vm1, %v499_v54, %v3200_v12  ;;  %v506_v58 = vsel %vm502_vm1, %v493_v55, %v501_v22  ;;  %v510_v59 = vsel %vm502_vm1, %v501_v22, %v493_v55  ;;  %v3264_v8 = vpop.permute.xlu2 %738 }
  0xb9   : > { %v522_v60 = vmul.f32 %v514_v52, %v509_v57  ;;  %v523_v61 = vmul.f32 %v515_v53, %v505_v56  ;;  %v524_v62 = vmul.f32 %v514_v52, %v510_v59  ;;  %v525_v63 = vmul.f32 %v515_v53, %v506_v58 }
  0xbb   : > { %v528_v9 = vpack.c.bf16 %v523_v61, %v522_v60  ;;  %v529_v10 = vpack.c.bf16 %v525_v63, %v524_v62 }
  0xbc   : > { %v2672_v13 = vld [vmem:[#allocation2 + $0x64] sm:$0xf0]  ;;  %v2363_v14 = vld [vmem:[#allocation2 + $0x68] sm:$0xf0] }
  0xbd   : > { %532 = vst [vmem:[#allocation2 + $0x50] sm:$0xff] %v528_v9  ;;  %648 = vrot.lane.b32.xlu1 %v3121_v6, %s2932_s11  ;;  %646 = vrot.lane.b32.xlu0 %v3124_v7, %s2932_s11  ;;  %v2361_v12 = vld [vmem:[#allocation2 + $0x60] sm:$0xf]  ;;  %v2671_v15 = vld [vmem:[#allocation2 + $0x64] sm:$0xf] }
  0xbe   : > { %533 = vst [vmem:[#allocation2 + $0x58] sm:$0xff] %v529_v10  ;;  %v2362_v16 = vor.u32 %v2672_v13, %v2361_v12  ;;  %v2366_v17 = vor.u32 %v2671_v15, %v2363_v14  ;;  %594 = vrot.lane.b32.xlu2 %v3094_v1, %s2933_s26 }
  0xbf   : > { %v489_v18 = vpop.permute.xlu1 %488  ;;  %v487_v19 = vpop.permute.xlu0 %486 }
  0xc0   : > { %1068 = vmatpush.bf16.msra.mxu0 %v2362_v16  ;;  %1125 = vmatpush.bf16.msra.mxu3 %v2366_v17  ;;  %v503_v20 = vsel %vm502_vm1, %v487_v19, %v3226_v30  ;;  %v507_v21 = vsel %vm502_vm1, %v3226_v30, %v487_v19  ;;  %v3278_v24 = vpop.permute.xlu2 %748 }
  0xc1   : > { %v518_v22 = vmul.f32 %v514_v52, %v507_v21  ;;  %v519_v23 = vmul.f32 %v515_v53, %v503_v20 }
  0xc3   : > { %v526_v25 = vpack.c.bf16 %v519_v23, %v518_v22 }
  0xc4   : > { %v2353_v26 = vld [vmem:[#allocation2 + $0x50] sm:$0xf]  ;;  %v2669_v27 = vld [vmem:[#allocation2 + $0x54] sm:$0xf] }
  0xc5   : > { %530 = vst [vmem:[#allocation2 + $0x40] sm:$0xff] %v526_v25  ;;  %602 = vrot.lane.b32.xlu1 %v3091_v0, %s2933_s26  ;;  %596 = vrot.lane.b32.xlu0 %v3109_v4, %s2933_s26  ;;  %v2670_v28 = vld [vmem:[#allocation2 + $0x54] sm:$0xf0]  ;;  %v2355_v29 = vld [vmem:[#allocation2 + $0x58] sm:$0xf0] }
  0xc6   : > { %v2354_v30 = vor.u32 %v2670_v28, %v2353_v26  ;;  %v2358_v31 = vor.u32 %v2669_v27, %v2355_v29  ;;  %604 = vrot.lane.b32.xlu2 %v3106_v3, %s2933_s26 }
  0xc7   : > { %v443_v32 = vpop.permute.xlu1 %442  ;;  %v497_v33 = vpop.permute.xlu0 %496 }
  0xc8   : > { %v504_v34 = vsel %vm502_vm1, %v489_v18, %v497_v33  ;;  %v508_v35 = vsel %vm502_vm1, %v497_v33, %v489_v18  ;;  %1069 = vmatpush.bf16.msra.mxu0 %v2354_v30  ;;  %1126 = vmatpush.bf16.msra.mxu3 %v2358_v31  ;;  %v3290_v38 = vpop.permute.xlu2 %446 }
  0xc9   : > { %v520_v36 = vmul.f32 %v514_v52, %v508_v35  ;;  %v521_v37 = vmul.f32 %v515_v53, %v504_v34 }
  0xcb   : > { %v527_v40 = vpack.c.bf16 %v521_v37, %v520_v36 }
  0xcc   : > { %v2345_v57 = vld [vmem:[#allocation2 + $0x40] sm:$0xf]  ;;  %v2667_v59 = vld [vmem:[#allocation2 + $0x44] sm:$0xf] }
  0xcd   : > { %531 = vst [vmem:[#allocation2 + $0x48] sm:$0xff] %v527_v40  ;;  %590 = vrot.lane.b32.xlu0 %v3101_v2, %s2933_s26  ;;  %592 = vrot.lane.b32.xlu1 %v3112_v5, %s2933_s26 }
  0xce   : > { %598 = vrot.lane.b32.xlu2 %v3124_v7, %s2933_s26 }
  0xcf   : > { %v453_v44 = vpop.permute.xlu1 %452  ;;  %v451_v45 = vpop.permute.xlu0 %450 }
  0xd0   : > { %v458_v46 = vsel %vm454_vm2, %v3242_v42, %v453_v44  ;;  %v462_v47 = vsel %vm454_vm2, %v453_v44, %v3242_v42  ;;  %v457_v48 = vsel %vm454_vm2, %v443_v32, %v451_v45  ;;  %v461_v49 = vsel %vm454_vm2, %v451_v45, %v443_v32  ;;  %v3320_v54 = vpop.permute.xlu2 %736  ;;  %v2286_v42 = vld [vmem:[%s4206_s1 + $0x10] sm:$0x3] }
  0xd1   : > { %v476_v50 = vmul.f32 %v3298_v41, %v462_v47  ;;  %v477_v51 = vmul.f32 %v3300_v43, %v458_v46  ;;  %v474_v52 = vmul.f32 %v3298_v41, %v461_v49  ;;  %v475_v53 = vmul.f32 %v3300_v43, %v457_v48 }
  0xd2   : > { %v762_v61 = vperm.slane %v2286_v42, 0  ;;  %v763_v62 = vperm.slane %v2286_v42, 1 }
  0xd3   : > { %v481_v55 = vpack.c.bf16 %v477_v51, %v476_v50  ;;  %v480_v56 = vpack.c.bf16 %v475_v53, %v474_v52 }
  0xd4   : > { %v2668_v58 = vld [vmem:[#allocation2 + $0x44] sm:$0xf0]  ;;  %v2347_v60 = vld [vmem:[#allocation2 + $0x48] sm:$0xf0] }
  0xd5   : > { %485 = vst [vmem:[#allocation2 + $0x38] sm:$0xff] %v481_v55  ;;  %600 = vrot.lane.b32.xlu0 %v3121_v6, %s2933_s26  ;;  %v2346_v63 = vor.u32 %v2668_v58, %v2345_v57  ;;  %v2350_v9 = vor.u32 %v2667_v59, %v2347_v60  ;;  %v416_v59 = vld [vmem:[%s4206_s1] sm:$0x3] }
  0xd6   : > { %484 = vst [vmem:[#allocation2 + $0x30] sm:$0xff] %v480_v56 }
  0xd7   : > { %v747_v10 = vpop.permute.xlu1 %746  ;;  %v741_v13 = vpop.permute.xlu0 %740  ;;  %1070 = vmatpush.bf16.msra.mxu0 %v2346_v63  ;;  %1127 = vmatpush.bf16.msra.mxu3 %v2350_v9 }
  0xd8   : > { %v753_v14 = vsel %vm750_vm3, %v3264_v8, %v747_v10  ;;  %v757_v12 = vsel %vm750_vm3, %v747_v10, %v3264_v8  ;;  %v754_v15 = vsel %vm750_vm3, %v741_v13, %v3278_v24  ;;  %v758_v16 = vsel %vm750_vm3, %v3278_v24, %v741_v13  ;;  %v3340_v21 = vpop.permute.xlu2 %393 }
  0xd9   : > { %v770_v17 = vmul.f32 %v762_v61, %v753_v14  ;;  %v771_v18 = vmul.f32 %v763_v62, %v757_v12  ;;  %v772_v19 = vmul.f32 %v762_v61, %v754_v15  ;;  %v773_v20 = vmul.f32 %v763_v62, %v758_v16 }
  0xda   : > { %v3370_v14 = vperm.slane %v416_v59, 0  ;;  %v3372_v12 = vperm.slane %v416_v59, 1 }
  0xdb   : > { %v776_v22 = vpack.c.bf16 %v771_v18, %v770_v17  ;;  %v777_v23 = vpack.c.bf16 %v773_v20, %v772_v19 }
  0xdc   : > { %v2666_v25 = vld [vmem:[#allocation2 + $0x34] sm:$0xf0]  ;;  %v2339_v26 = vld [vmem:[#allocation2 + $0x38] sm:$0xf0] }
  0xdd   : > { %780 = vst [vmem:[#allocation2 + $0x110] sm:$0xff] %v776_v22  ;;  %v2337_v8 = vld [vmem:[#allocation2 + $0x30] sm:$0xf]  ;;  %v2665_v27 = vld [vmem:[#allocation2 + $0x34] sm:$0xf] }
  0xde   : > { %781 = vst [vmem:[#allocation2 + $0x118] sm:$0xff] %v777_v23  ;;  %v2338_v28 = vor.u32 %v2666_v25, %v2337_v8  ;;  %v2342_v29 = vor.u32 %v2665_v27, %v2339_v26  ;;  %v2285_v27 = vld [vmem:[%s4206_s1 + $0xe] sm:$0x3] }
  0xdf   : > { %v441_v30 = vpop.permute.xlu1 %440  ;;  %v439_v31 = vpop.permute.xlu0 %438 }
  0xe0   : > { %1071 = vmatpush.bf16.msra.mxu0 %v2338_v28  ;;  %1128 = vmatpush.bf16.msra.mxu3 %v2342_v29  ;;  %v455_v24 = vsel %vm454_vm2, %v439_v31, %v3290_v38  ;;  %v459_v32 = vsel %vm454_vm2, %v3290_v38, %v439_v31  ;;  %v404_v35 = vpop.permute.xlu2 %403  ;;  %v714_v31 = vperm.slane %v2285_v27, 0 }
  0xe1   : > { %v470_v33 = vmul.f32 %v3298_v41, %v459_v32  ;;  %v471_v34 = vmul.f32 %v3300_v43, %v455_v24  ;;  %v715_v24 = vperm.slane %v2285_v27, 1 }
  0xe3   : > { %v478_v36 = vpack.c.bf16 %v471_v34, %v470_v33 }
  0xe4   : > { %v2449_v37 = vld [vmem:[#allocation2 + $0x110] sm:$0xf] }
  0xe5   : > { %482 = vst [vmem:[#allocation2 + $0x20] sm:$0xff] %v478_v36  ;;  %v2694_v39 = vld [vmem:[#allocation2 + $0x114] sm:$0xf0] }
  0xe6   : > { %v2450_v40 = vor.u32 %v2694_v39, %v2449_v37 }
  0xe7   : > { %v735_v44 = vpop.permute.xlu1 %734  ;;  %v449_v45 = vpop.permute.xlu0 %448 }
  0xe8   : > { %v456_v46 = vsel %vm454_vm2, %v441_v30, %v449_v45  ;;  %v460_v47 = vsel %vm454_vm2, %v449_v45, %v441_v30  ;;  %1111 = vmatpush.bf16.msra.mxu2 %v2450_v40  ;;  %v699_v50 = vpop.permute.xlu2 %698 }
  0xe9   : > { %v472_v38 = vmul.f32 %v3298_v41, %v460_v47  ;;  %v473_v48 = vmul.f32 %v3300_v43, %v456_v46 }
  0xeb   : > { %v479_v49 = vpack.c.bf16 %v473_v48, %v472_v38 }
  0xec   : > { %v2329_v9 = vld [vmem:[#allocation2 + $0x20] sm:$0xf]  ;;  %v2663_v10 = vld [vmem:[#allocation2 + $0x24] sm:$0xf] }
  0xed   : > { %483 = vst [vmem:[#allocation2 + $0x28] sm:$0xff] %v479_v49 }
  0xef   : > { %v745_v51 = vpop.permute.xlu1 %744  ;;  %v743_v52 = vpop.permute.xlu0 %742 }
  0xf0   : > { %v752_v53 = vsel %vm750_vm3, %v3320_v54, %v745_v51  ;;  %v756_v42 = vsel %vm750_vm3, %v745_v51, %v3320_v54  ;;  %v751_v55 = vsel %vm750_vm3, %v735_v44, %v743_v52  ;;  %v755_v41 = vsel %vm750_vm3, %v743_v52, %v735_v44 }
  0xf1   : > { %v768_v43 = vmul.f32 %v762_v61, %v752_v53  ;;  %v769_v56 = vmul.f32 %v763_v62, %v756_v42  ;;  %v766_v57 = vmul.f32 %v762_v61, %v751_v55  ;;  %v767_v58 = vmul.f32 %v763_v62, %v755_v41  ;;  %v392_v62 = vpop.permute.xlu2 %391 }
  0xf3   : > { %v775_v60 = vpack.c.bf16 %v769_v56, %v768_v43  ;;  %v774_v63 = vpack.c.bf16 %v767_v58, %v766_v57 }
  0xf4   : > { %v2664_v54 = vld [vmem:[#allocation2 + $0x24] sm:$0xf0]  ;;  %v2331_v13 = vld [vmem:[#allocation2 + $0x28] sm:$0xf0] }
  0xf5   : > { %779 = vst [vmem:[#allocation2 + $0x108] sm:$0xff] %v775_v60  ;;  %v2330_v15 = vor.u32 %v2664_v54, %v2329_v9  ;;  %v2334_v61 = vor.u32 %v2663_v10, %v2331_v13 }
  0xf6   : > { %778 = vst [vmem:[#allocation2 + $0x100] sm:$0xff] %v774_v63 }
  0xf7   : > { %v402_v16 = vpop.permute.xlu1 %401  ;;  %v396_v17 = vpop.permute.xlu0 %395  ;;  %1072 = vmatpush.bf16.msra.mxu0 %v2330_v15  ;;  %1129 = vmatpush.bf16.msra.mxu3 %v2334_v61 }
  0xf8   : > { %v410_v18 = vsel %vm407_vm4, %v3340_v21, %v402_v16  ;;  %v414_v19 = vsel %vm407_vm4, %v402_v16, %v3340_v21  ;;  %v411_v20 = vsel %vm407_vm4, %v396_v17, %v404_v35  ;;  %v415_v22 = vsel %vm407_vm4, %v404_v35, %v396_v17 }
  0xf9   : > { %v426_v23 = vmul.f32 %v3370_v14, %v414_v19  ;;  %v427_v25 = vmul.f32 %v3372_v12, %v410_v18  ;;  %v428_v26 = vmul.f32 %v3370_v14, %v415_v22  ;;  %v429_v8 = vmul.f32 %v3372_v12, %v411_v20  ;;  %v687_v37 = vpop.permute.xlu2 %686 }
  0xfb   : > { %v432_v28 = vpack.c.bf16 %v427_v25, %v426_v23  ;;  %v433_v21 = vpack.c.bf16 %v429_v8, %v428_v26 }
  0xfc   : > { %v2692_v29 = vld [vmem:[#allocation2 + $0x104] sm:$0xf0] }
  0xfd   : > { %436 = vst [vmem:[#allocation2 + $0x10] sm:$0xff] %v432_v28  ;;  %v2441_v30 = vld [vmem:[#allocation2 + $0x100] sm:$0xf] }
  0xfe   : > { %437 = vst [vmem:[#allocation2 + $0x18] sm:$0xff] %v433_v21  ;;  %v2442_v32 = vor.u32 %v2692_v29, %v2441_v30  ;;  %v2284_v30 = vld [vmem:[%s4206_s1 + $0xc] sm:$0x3] }
  0xff   : > { %v693_v33 = vpop.permute.xlu1 %692  ;;  %v691_v34 = vpop.permute.xlu0 %690 }
 0x100   : > { %1112 = vmatpush.bf16.msra.mxu2 %v2442_v32  ;;  %v705_v35 = vsel %vm702_vm5, %v691_v34, %v699_v50  ;;  %v709_v36 = vsel %vm702_vm5, %v699_v50, %v691_v34  ;;  %v2693_v34 = vld [vmem:[#allocation2 + $0x114] sm:$0xf] }
 0x101   : > { %v722_v39 = vmul.f32 %v714_v31, %v705_v35  ;;  %v723_v40 = vmul.f32 %v715_v24, %v709_v36  ;;  %v697_v41 = vpop.permute.xlu2 %696  ;;  %v2451_v35 = vld [vmem:[#allocation2 + $0x118] sm:$0xf0] }
 0x103   : > { %v728_v44 = vpack.c.bf16 %v723_v40, %v722_v39  ;;  %v3424_v39 = vperm.slane %v2284_v30, 0 }
 0x104   : > { %v2321_v45 = vld [vmem:[#allocation2 + $0x10] sm:$0xf]  ;;  %v2661_v46 = vld [vmem:[#allocation2 + $0x14] sm:$0xf] }
 0x105   : > { %732 = vst [vmem:[#allocation2 + $0xf0] sm:$0xff] %v728_v44  ;;  %v2662_v47 = vld [vmem:[#allocation2 + $0x14] sm:$0xf0]  ;;  %v2323_v38 = vld [vmem:[#allocation2 + $0x18] sm:$0xf0] }
 0x106   : > { %v2322_v48 = vor.u32 %v2662_v47, %v2321_v45  ;;  %v2326_v49 = vor.u32 %v2661_v46, %v2323_v38  ;;  %v667_v45 = vperm.slane %v2284_v30, 1 }
 0x107   : > { %v390_v51 = vpop.permute.xlu1 %389  ;;  %v701_v52 = vpop.permute.xlu0 %700 }
 0x108   : > { %v706_v53 = vsel %vm702_vm5, %v693_v33, %v701_v52  ;;  %v710_v42 = vsel %vm702_vm5, %v701_v52, %v693_v33  ;;  %1073 = vmatpush.bf16.msra.mxu0 %v2322_v48  ;;  %1130 = vmatpush.bf16.msra.mxu3 %v2326_v49  ;;  %v2454_v48 = vor.u32 %v2693_v34, %v2451_v35  ;;  %v2443_v49 = vld [vmem:[#allocation2 + $0x108] sm:$0xf0]  ;;  %v2283_v34 = vld [vmem:[%s4206_s1 + $0xa] sm:$0x3] }
 0x109   : > { %v724_v50 = vmul.f32 %v714_v31, %v706_v53  ;;  %v725_v55 = vmul.f32 %v715_v24, %v710_v42  ;;  %v651_v19 = vpop.permute.xlu2 %650  ;;  %v2691_v53 = vld [vmem:[#allocation2 + $0x104] sm:$0xf]  ;;  %v2297_v42 = vld [vmem:[%s4207_s2 + $0x8] sm:$0xf]  ;;  %v584_v35 = vpack.c.bf16 %v3091_v0, %v3094_v1  ;;  %v582_v0 = vpack.c.bf16 %v3124_v7, %v3101_v2 }
 0x10a   : > { %v3484_v1 = vperm.slane %v2283_v34, 1  ;;  %v2657_v2 = vld [vmem:[%s4207_s2 + $0x20] sm:$0xf0] }
 0x10b   : > { %v729_v43 = vpack.c.bf16 %v725_v55, %v724_v50  ;;  %v2655_v50 = vld [vmem:[%s4207_s2 + $0x10] sm:$0xf0]  ;;  %588 = vst [vmem:[#allocation2 + $0x90] sm:$0xff] %v584_v35 }
 0x10c   : > { %v2433_v16 = vld [vmem:[#allocation2 + $0xf0] sm:$0xf]  ;;  %v2689_v18 = vld [vmem:[#allocation2 + $0xf4] sm:$0xf]  ;;  %586 = vst [vmem:[#allocation2 + $0x80] sm:$0xff] %v582_v0 }
 0x10d   : > { %733 = vst [vmem:[#allocation2 + $0xf8] sm:$0xff] %v729_v43  ;;  %v3437_v43 = vor.u32 %v2655_v50, %v2297_v42 }
 0x10f   : > { %v400_v56 = vpop.permute.xlu1 %399  ;;  %v398_v57 = vpop.permute.xlu0 %397  ;;  %2455 = vmatmul.msk.bf16.vlgmr.msra.gmra.mxu2 %vm1060_vm7, %v3437_v43 }
 0x110   : > { %v409_v58 = vsel %vm407_vm4, %v392_v62, %v400_v56  ;;  %v413_v59 = vsel %vm407_vm4, %v400_v56, %v392_v62  ;;  %v408_v60 = vsel %vm407_vm4, %v390_v51, %v398_v57  ;;  %v412_v63 = vsel %vm407_vm4, %v398_v57, %v390_v51 }
 0x111   : > { %v424_v9 = vmul.f32 %v3370_v14, %v413_v59  ;;  %v425_v54 = vmul.f32 %v3372_v12, %v409_v58  ;;  %v422_v10 = vmul.f32 %v3370_v14, %v412_v63  ;;  %v423_v13 = vmul.f32 %v3372_v12, %v408_v60  ;;  %v641_v46 = vpop.permute.xlu2 %640 }
 0x112   : > { %v2446_v57 = vor.u32 %v2691_v53, %v2443_v49  ;;  %v2677_v35 = vld [vmem:[#allocation2 + $0x94] sm:$0xf] }
 0x113   : > { %v431_v15 = vpack.c.bf16 %v425_v54, %v424_v9  ;;  %v430_v61 = vpack.c.bf16 %v423_v13, %v422_v10 }
 0x114   : > { %v2690_v17 = vld [vmem:[#allocation2 + $0xf4] sm:$0xf0]  ;;  %v2435_v62 = vld [vmem:[#allocation2 + $0xf8] sm:$0xf0] }
 0x115   : > { %435 = vst [vmem:[#allocation2 + $0x8] sm:$0xff] %v431_v15  ;;  %v2434_v20 = vor.u32 %v2690_v17, %v2433_v16  ;;  %v2438_v22 = vor.u32 %v2689_v18, %v2435_v62  ;;  %v2289_v16 = vld [vmem:[%s4207_s2] sm:$0xf]  ;;  %v2654_v17 = vld [vmem:[%s4207_s2 + $0x8] sm:$0xf0] }
 0x116   : > { %434 = vst [vmem:[#allocation2] sm:$0xff] %v430_v61 }
 0x117   : > { %v695_v23 = vpop.permute.xlu1 %694  ;;  %v689_v25 = vpop.permute.xlu0 %688  ;;  %1086 = vmatpush.bf16.msra.mxu1 %v2434_v20  ;;  %1143 = vmatpush.bf16.msrb.mxu2 %v2438_v22  ;;  %v2290_v20 = vor.u32 %v2654_v17, %v2289_v16  ;;  %v2934_v17 = vmov 0  }
 0x118   : > { %v703_v14 = vsel %vm702_vm5, %v687_v37, %v695_v23  ;;  %v707_v12 = vsel %vm702_vm5, %v695_v23, %v687_v37  ;;  %v704_v26 = vsel %vm702_vm5, %v689_v25, %v697_v41  ;;  %v708_v8 = vsel %vm702_vm5, %v697_v41, %v689_v25  ;;  %v2309_v23 = vld [vmem:[%s4207_s2 + $0x20] sm:$0xf]  ;;  %v2658_v25 = vld [vmem:[%s4207_s2 + $0x28] sm:$0xf0]  ;;  %2797 = vset.pattern.permute.xlu1 %v2934_v17 }
 0x119   : > { %v718_v27 = vmul.f32 %v714_v31, %v703_v14  ;;  %v719_v28 = vmul.f32 %v715_v24, %v707_v12  ;;  %v720_v21 = vmul.f32 %v714_v31, %v704_v26  ;;  %v721_v29 = vmul.f32 %v715_v24, %v708_v8  ;;  %2799 = vset.pattern.permute.xlu0 %v2934_v17 }
 0x11a   : > { %v3458_v26 = vor.u32 %v2658_v25, %v2309_v23  ;;  %2798 = vset.pattern.permute.xlu2 %v2934_v17 }
 0x11b   : > { %v726_v32 = vpack.c.bf16 %v719_v28, %v718_v27  ;;  %v727_v33 = vpack.c.bf16 %v721_v29, %v720_v21 }
 0x11c   : > { %v2660_v36 = vld [vmem:[#allocation2 + $0x4] sm:$0xf0]  ;;  %v2315_v37 = vld [vmem:[#allocation2 + $0x8] sm:$0xf0] }
 0x11d   : > { %730 = vst [vmem:[#allocation2 + $0xe0] sm:$0xff] %v726_v32  ;;  %v2313_v40 = vld [vmem:[#allocation2] sm:$0xf]  ;;  %v2659_v44 = vld [vmem:[#allocation2 + $0x4] sm:$0xf] }
 0x11e   : > { %731 = vst [vmem:[#allocation2 + $0xe8] sm:$0xff] %v727_v33  ;;  %v2314_v31 = vor.u32 %v2660_v36, %v2313_v40  ;;  %v2318_v24 = vor.u32 %v2659_v44, %v2315_v37 }
 0x11f   : > { %v645_v47 = vpop.permute.xlu1 %644  ;;  %v643_v38 = vpop.permute.xlu0 %642  ;;  %2456 = vmatmul.msk.bf16.gmra.mxu2 %vm1060_vm7, %v3458_v26 }
 0x120   : > { %1074 = vmatpush.bf16.msra.mxu0 %v2314_v31  ;;  %1131 = vmatpush.bf16.msra.mxu3 %v2318_v24  ;;  %v657_v51 = vsel %vm654_vm6, %v643_v38, %v651_v19  ;;  %v661_v52 = vsel %vm654_vm6, %v651_v19, %v643_v38  ;;  %v595_v19 = vpop.permute.xlu2 %594 }
 0x121   : > { %v674_v55 = vmul.f32 %v3424_v39, %v657_v51  ;;  %v675_v41 = vmul.f32 %v667_v45, %v661_v52 }
 0x123   : > { %v680_v56 = vpack.c.bf16 %v675_v41, %v674_v55  ;;  %1075 = vmatmul.bf16.vlgmr.msra.gmra.mxu0 %v2290_v20  ;;  %1132 = vmatmul.bf16.vlgmr.msra.gmra.mxu3 %v2290_v20 }
 0x124   : > { %1168 = vmatpush.bf16.msrb.mxu0 %v2454_v48  ;;  %v2425_v58 = vld [vmem:[#allocation2 + $0xe0] sm:$0xf]  ;;  %v2687_v59 = vld [vmem:[#allocation2 + $0xe4] sm:$0xf]  ;;  %v583_v48 = vpack.c.bf16 %v3121_v6, %v3112_v5 }
 0x125   : > { %684 = vst [vmem:[#allocation2 + $0xd0] sm:$0xff] %v680_v56  ;;  %v2688_v60 = vld [vmem:[#allocation2 + $0xe4] sm:$0xf0]  ;;  %v2427_v63 = vld [vmem:[#allocation2 + $0xe8] sm:$0xf0] }
 0x126   : > { %v2426_v9 = vor.u32 %v2688_v60, %v2425_v58  ;;  %v2430_v54 = vor.u32 %v2687_v59, %v2427_v63  ;;  %587 = vst [vmem:[#allocation2 + $0x88] sm:$0xff] %v583_v48 }
 0x127   : > { %v639_v10 = vpop.permute.xlu1 %638  ;;  %v653_v13 = vpop.permute.xlu0 %652 }
 0x128   : > { %1169 = vmatpush.bf16.msrb.mxu0 %v2446_v57  ;;  %v658_v15 = vsel %vm654_vm6, %v645_v47, %v653_v13  ;;  %v662_v61 = vsel %vm654_vm6, %v653_v13, %v645_v47  ;;  %1087 = vmatpush.bf16.msra.mxu1 %v2426_v9  ;;  %v605_v31 = vpop.permute.xlu2 %604 }
 0x129   : > { %1144 = vmatpush.bf16.msrb.mxu2 %v2430_v54  ;;  %v676_v18 = vmul.f32 %v3424_v39, %v658_v15  ;;  %v677_v62 = vmul.f32 %v667_v45, %v662_v61 }
 0x12b   : > { %v681_v22 = vpack.c.bf16 %v677_v62, %v676_v18  ;;  %v828_v18 = vld [vmem:[%s4208_s3 + $0x10] sm:$0xff]  ;;  %v826_v62 = vld [vmem:[%s4208_s3] sm:$0xff] }
 0x12c   : > { %v2417_v40 = vld [vmem:[#allocation2 + $0xd0] sm:$0xf]  ;;  %v2685_v44 = vld [vmem:[#allocation2 + $0xd4] sm:$0xf]  ;;  %842 = vperm.xlu1 %2797, %v828_v18   ;;  %832 = vperm.xlu0 %2799, %v826_v62  }
 0x12d   : > { %685 = vst [vmem:[#allocation2 + $0xd8] sm:$0xff] %v681_v22  ;;  %v2379_v48 = vld [vmem:[#allocation2 + $0x88] sm:$0xf0] }
 0x12f   : > { %v649_v14 = vpop.permute.xlu1 %648  ;;  %v647_v12 = vpop.permute.xlu0 %646 }
 0x130   : > { %v656_v8 = vsel %vm654_vm6, %v641_v46, %v649_v14  ;;  %v660_v27 = vsel %vm654_vm6, %v649_v14, %v641_v46  ;;  %v655_v28 = vsel %vm654_vm6, %v639_v10, %v647_v12  ;;  %v659_v21 = vsel %vm654_vm6, %v647_v12, %v639_v10  ;;  %v599_v63 = vpop.permute.xlu2 %598 }
 0x131   : > { %v672_v29 = vmul.f32 %v3424_v39, %v656_v8  ;;  %v673_v30 = vmul.f32 %v667_v45, %v660_v27  ;;  %v670_v32 = vmul.f32 %v3424_v39, %v655_v28  ;;  %v671_v33 = vmul.f32 %v667_v45, %v659_v21 }
 0x132   : > { %v585_v39 = vpack.c.bf16 %v3106_v3, %v3109_v4  ;;  %v3480_v45 = vperm.slane %v2283_v34, 0  ;;  %v2301_v3 = vld [vmem:[%s4207_s2 + $0x18] sm:$0xf]  ;;  %v2385_v34 = vld [vmem:[#allocation2 + $0x90] sm:$0xf] }
 0x133   : > { %v679_v36 = vpack.c.bf16 %v673_v30, %v672_v29  ;;  %v678_v37 = vpack.c.bf16 %v671_v33, %v670_v32  ;;  %v2302_v55 = vor.u32 %v2657_v2, %v2301_v3  ;;  %v827_v29 = vld [vmem:[%s4208_s3 + $0x8] sm:$0xff]  ;;  %v2653_v3 = vld [vmem:[%s4207_s2 + $0x4] sm:$0xf]  ;;  %v2291_v2 = vld [vmem:[%s4207_s2 + $0xc] sm:$0xf0] }
 0x134   : > { %v2686_v24 = vld [vmem:[#allocation2 + $0xd4] sm:$0xf0]  ;;  %v2419_v46 = vld [vmem:[#allocation2 + $0xd8] sm:$0xf0]  ;;  %589 = vst [vmem:[#allocation2 + $0x98] sm:$0xff] %v585_v39  ;;  %837 = vperm.xlu1 %2797, %v827_v29  }
 0x135   : > { %683 = vst [vmem:[#allocation2 + $0xc8] sm:$0xff] %v679_v36  ;;  %v2418_v47 = vor.u32 %v2686_v24, %v2417_v40  ;;  %v2422_v38 = vor.u32 %v2685_v44, %v2419_v46  ;;  %1080 = vmatmul.bf16.gmra.mxu0 %v2302_v55  ;;  %1137 = vmatmul.bf16.gmra.mxu3 %v2302_v55  ;;  %v829_v36 = vld [vmem:[%s4208_s3 + $0x18] sm:$0xff] }
 0x136   : > { %682 = vst [vmem:[#allocation2 + $0xc0] sm:$0xff] %v678_v37  ;;  %847 = vperm.xlu2 %2798, %v829_v36  }
 0x137   : > { %v603_v49 = vpop.permute.xlu1 %602  ;;  %v597_v51 = vpop.permute.xlu0 %596  ;;  %1088 = vmatpush.bf16.msra.mxu1 %v2418_v47  ;;  %1145 = vmatpush.bf16.msrb.mxu2 %v2422_v38  ;;  %v2676_v47 = vld [vmem:[#allocation2 + $0x84] sm:$0xf0]  ;;  %v2675_v38 = vld [vmem:[#allocation2 + $0x84] sm:$0xf] }
 0x138   : > { %v609_v4 = vsel %vm606_vm8, %v595_v19, %v603_v49  ;;  %v613_v5 = vsel %vm606_vm8, %v603_v49, %v595_v19  ;;  %v610_v6 = vsel %vm606_vm8, %v597_v51, %v605_v31  ;;  %v614_v7 = vsel %vm606_vm8, %v605_v31, %v597_v51 }
 0x139   : > { %v626_v52 = vmul.f32 %v3480_v45, %v609_v4  ;;  %v627_v53 = vmul.f32 %v3484_v1, %v613_v5  ;;  %v628_v42 = vmul.f32 %v3480_v45, %v610_v6  ;;  %v629_v50 = vmul.f32 %v3484_v1, %v614_v7  ;;  %v2656_v5 = vld [vmem:[%s4207_s2 + $0x1c] sm:$0xf]  ;;  %v2303_v6 = vld [vmem:[%s4207_s2 + $0x24] sm:$0xf0] }
 0x13a   : > { %v2382_v51 = vor.u32 %v2675_v38, %v2379_v48  ;;  %v2294_v4 = vor.u32 %v2653_v3, %v2291_v2  ;;  %v2306_v7 = vor.u32 %v2656_v5, %v2303_v6 }
 0x13b   : > { %v632_v41 = vpack.c.bf16 %v627_v53, %v626_v52  ;;  %v633_v56 = vpack.c.bf16 %v629_v50, %v628_v42  ;;  %v2678_v40 = vld [vmem:[#allocation2 + $0x94] sm:$0xf0]  ;;  %v2387_v44 = vld [vmem:[#allocation2 + $0x98] sm:$0xf0] }
 0x13c   : > { %v2684_v57 = vld [vmem:[#allocation2 + $0xc4] sm:$0xf0]  ;;  %v2411_v58 = vld [vmem:[#allocation2 + $0xc8] sm:$0xf0]  ;;  %v2386_v0 = vor.u32 %v2678_v40, %v2385_v34 }
 0x13d   : > { %636 = vst [vmem:[#allocation2 + $0xb0] sm:$0xff] %v632_v41  ;;  %v2409_v59 = vld [vmem:[#allocation2 + $0xc0] sm:$0xf]  ;;  %v2683_v60 = vld [vmem:[#allocation2 + $0xc4] sm:$0xf] }
 0x13e   : > { %637 = vst [vmem:[#allocation2 + $0xb8] sm:$0xff] %v633_v56  ;;  %v2410_v9 = vor.u32 %v2684_v57, %v2409_v59  ;;  %v2414_v54 = vor.u32 %v2683_v60, %v2411_v58 }
 0x13f   : > { %v591_v10 = vpop.permute.xlu0 %590  ;;  %v593_v23 = vpop.permute.xlu1 %592 }
 0x140   : > { %1089 = vmatpush.bf16.msra.mxu1 %v2410_v9  ;;  %1146 = vmatpush.bf16.msrb.mxu2 %v2414_v54  ;;  %v607_v13 = vsel %vm606_vm8, %v591_v10, %v599_v63  ;;  %v611_v15 = vsel %vm606_vm8, %v599_v63, %v591_v10 }
 0x141   : > { %v622_v61 = vmul.f32 %v3480_v45, %v607_v13  ;;  %v623_v16 = vmul.f32 %v3484_v1, %v611_v15 }
 0x143   : > { %v630_v19 = vpack.c.bf16 %v623_v16, %v622_v61 }
 0x144   : > { %v2401_v20 = vld [vmem:[#allocation2 + $0xb0] sm:$0xf]  ;;  %v2681_v22 = vld [vmem:[#allocation2 + $0xb4] sm:$0xf] }
 0x145   : > { %634 = vst [vmem:[#allocation2 + $0xa0] sm:$0xff] %v630_v19  ;;  %v2682_v25 = vld [vmem:[#allocation2 + $0xb4] sm:$0xf0]  ;;  %v2403_v14 = vld [vmem:[#allocation2 + $0xb8] sm:$0xf0]  ;;  %2457 = vmatmul.msk.bf16.vlgmr.msrb.gmra.mxu0 %vm1060_vm7, %v3437_v43  ;;  %v2390_v43 = vor.u32 %v2677_v35, %v2387_v44 }
 0x146   : > { %v2402_v12 = vor.u32 %v2682_v25, %v2401_v20  ;;  %v2406_v8 = vor.u32 %v2681_v22, %v2403_v14 }
 0x147   : > { %v601_v27 = vpop.permute.xlu0 %600 }
 0x148   : > { %v608_v28 = vsel %vm606_vm8, %v593_v23, %v601_v27  ;;  %v612_v21 = vsel %vm606_vm8, %v601_v27, %v593_v23  ;;  %1090 = vmatpush.bf16.msra.mxu1 %v2402_v12  ;;  %1147 = vmatpush.bf16.msrb.mxu2 %v2406_v8 }
 0x149   : > { %v624_v30 = vmul.f32 %v3480_v45, %v608_v28  ;;  %v625_v32 = vmul.f32 %v3484_v1, %v612_v21  ;;  %v2377_v1 = vld [vmem:[#allocation2 + $0x80] sm:$0xf] }
 0x14a   : > { %v2378_v49 = vor.u32 %v2676_v47, %v2377_v1 }
 0x14b   : > { %v631_v33 = vpack.c.bf16 %v625_v32, %v624_v30 }
 0x14c   : > { %v2393_v37 = vld [vmem:[#allocation2 + $0xa0] sm:$0xf]  ;;  %v2679_v39 = vld [vmem:[#allocation2 + $0xa4] sm:$0xf] }
 0x14d   : > { %635 = vst [vmem:[#allocation2 + $0xa8] sm:$0xff] %v631_v33 }
 0x154   : > { %v2680_v31 = vld [vmem:[#allocation2 + $0xa4] sm:$0xf0]  ;;  %v2395_v45 = vld [vmem:[#allocation2 + $0xa8] sm:$0xf0] }
 0x155   : > { %v2394_v24 = vor.u32 %v2680_v31, %v2393_v37  ;;  %v2398_v46 = vor.u32 %v2679_v39, %v2395_v45  ;;  %2458 = vmatmul.msk.bf16.gmra.mxu0 %vm1060_vm7, %v3458_v26 }
 0x157   : > { %1091 = vmatpush.bf16.msra.mxu1 %v2394_v24  ;;  %1148 = vmatpush.bf16.msrb.mxu2 %v2398_v46 }
 0x15b   : > { %1092 = vmatpush.bf16.msra.mxu1 %v2386_v0  ;;  %1149 = vmatpush.bf16.msrb.mxu2 %v2390_v43 }
 0x15f   : > { %1093 = vmatpush.bf16.msra.mxu1 %v2378_v49  ;;  %1150 = vmatpush.bf16.msrb.mxu2 %v2382_v51 }
 0x162   : > { %1094 = vmatmul.bf16.vlgmr.msra.gmra.mxu1 %v2294_v4  ;;  %1151 = vmatmul.bf16.vlgmr.msrb.gmra.mxu2 %v2294_v4 }
 0x172   : > { %1099 = vmatmul.bf16.gmra.mxu1 %v2306_v7  ;;  %1156 = vmatmul.bf16.gmra.mxu2 %v2306_v7 }
 0x190   : > { %v848_v33 = vpop.permute.xlu2 %847 }
 0x192   : > { %v1114_v53 = vpop.f32.mrf.mxu2 }
 0x19a   : > { %v1116_v26 = vpop.f32.mrf.mxu2 }
 0x19e   : > { %v833_v56 = vpop.permute.xlu0 %832  ;;  %v843_v58 = vpop.permute.xlu1 %842 }
 0x1a0   : > { %v1076_v52 = vpop.f32.mrf.mxu0 }
 0x1a1   : > { %v1077_v60 = vadd.f32 %v1076_v52, %v833_v56 }
 0x1a2   : > { %v1119_v55 = vpop.f32.mrf.mxu2 }
 0x1a6   : > { %v1133_v57 = vpop.f32.mrf.mxu3  ;;  %v838_v16 = vpop.permute.xlu1 %837 }
 0x1a7   : > { %v1134_v13 = vadd.f32 %v1133_v57, %v833_v56 }
 0x1a8   : > { %v1078_v42 = vpop.f32.mrf.mxu0 }
 0x1a9   : > { %v1079_v19 = vadd.f32 %v1078_v42, %v838_v16 }
 0x1aa   : > { %v1121_v59 = vpop.f32.mrf.mxu2 }
 0x1ae   : > { %v1135_v15 = vpop.f32.mrf.mxu3 }
 0x1af   : > { %v1136_v14 = vadd.f32 %v1135_v15, %v838_v16 }
 0x1b2   : > { %v1081_v50 = vpop.f32.mrf.mxu0 }
 0x1b3   : > { %v1082_v30 = vadd.f32 %v1081_v50, %v843_v58 }
 0x1b8   : > { %v1138_v21 = vpop.f32.mrf.mxu3 }
 0x1b9   : > { %v1139_v40 = vadd.f32 %v1138_v21, %v843_v58  ;;  %v1610_v21 = vld [vmem:[%s4210_s5 + $0x8] sm:$0xff] }
 0x1ba   : > { %v1083_v41 = vpop.f32.mrf.mxu0 }
 0x1bb   : > { %v1084_v31 = vadd.f32 %v1083_v41, %v848_v33 }
 0x1c0   : > { %v1140_v46 = vpop.f32.mrf.mxu3 }
 0x1c1   : > { %v1141_v48 = vadd.f32 %v1140_v46, %v848_v33 }
 0x1c2   : > { %v1171_v9 = vpop.f32.mrf.mxu0 }
 0x1ca   : > { %v1173_v22 = vpop.f32.mrf.mxu0 }
 0x1d2   : > { %v1176_v37 = vpop.f32.mrf.mxu0 }
 0x1da   : > { %v1178_v2 = vpop.f32.mrf.mxu0 }
 0x1df   : > { %v1095_v63 = vpop.f32.mrf.mxu1 }
 0x1e0   : > { %v1096_v54 = vadd.f32 %v1095_v63, %v1077_v60 }
 0x1e2   : > { %v1115_v10 = vadd.f32 %v1114_v53, %v1096_v54 }
 0x1e4   : > { %v3546_v61 = vmax.f32 %v1115_v10, 0.0 }
 0x1e5   : > { %v1152_v17 = vpop.f32.mrf.mxu2 }
 0x1e6   : > { %v1153_v18 = vadd.f32 %v1152_v17, %v1134_v13  ;;  %1281 = vrot.lane.b32.xlu1 %v3546_v61, %s2927_s22  ;;  %1327 = vrot.lane.b32.xlu0 %v3546_v61, %s2926_s15 }
 0x1e7   : > { %1473 = vrot.lane.b32.xlu2 %v3546_v61, %s2931_s29  ;;  %v1097_v62 = vpop.f32.mrf.mxu1 }
 0x1e8   : > { %v1172_v20 = vadd.f32 %v1171_v9, %v1153_v18  ;;  %v1098_v23 = vadd.f32 %v1097_v62, %v1079_v19  ;;  %v2461_v19 = vld [vmem:[%s4206_s1 + $0x6] sm:$0x3] }
 0x1ea   : > { %v3554_v25 = vmax.f32 %v1172_v20, 0.0  ;;  %v1117_v27 = vadd.f32 %v1116_v26, %v1098_v23  ;;  %v3728_v20 = vperm.slane %v2461_v19, 1 }
 0x1ec   : > { %v1373_v12 = vpack.c.bf16 %v3554_v25, %v3546_v61  ;;  %v3564_v34 = vmax.f32 %v1117_v27, 0.0 }
 0x1ed   : > { %v1154_v8 = vpop.f32.mrf.mxu2 }
 0x1ee   : > { %1377 = vst [vmem:[#allocation2 + $0x80] sm:$0xff] %v1373_v12  ;;  %v1155_v28 = vadd.f32 %v1154_v8, %v1136_v14  ;;  %1381 = vrot.lane.b32.xlu1 %v3546_v61, %s2933_s26  ;;  %1427 = vrot.lane.b32.xlu0 %v3546_v61, %s2932_s11 }
 0x1ef   : > { %1235 = vrot.lane.b32.xlu2 %v3546_v61, %s4236_s24  ;;  %v1100_v29 = vpop.f32.mrf.mxu1 }
 0x1f0   : > { %v1174_v32 = vadd.f32 %v1173_v22, %v1155_v28  ;;  %v1101_v35 = vadd.f32 %v1100_v29, %v1082_v30  ;;  %v1612_v29 = vld [vmem:[%s4210_s5 + $0x18] sm:$0xff]  ;;  %v2460_v30 = vld [vmem:[%s4206_s1 + $0x4] sm:$0x3] }
 0x1f2   : > { %v3566_v36 = vmax.f32 %v1174_v32, 0.0  ;;  %v1120_v45 = vadd.f32 %v1119_v55, %v1101_v35  ;;  %v2463_v32 = vld [vmem:[%s4206_s1 + $0xc] sm:$0x3]  ;;  %v3754_v35 = vperm.slane %v2460_v30, 1 }
 0x1f4   : > { %v1374_v44 = vpack.c.bf16 %v3566_v36, %v3564_v34  ;;  %v3576_v47 = vmax.f32 %v1120_v45, 0.0 }
 0x1f5   : > { %v1157_v39 = vpop.f32.mrf.mxu2 }
 0x1f6   : > { %1378 = vst [vmem:[#allocation2 + $0x88] sm:$0xff] %v1374_v44  ;;  %v1158_v24 = vadd.f32 %v1157_v39, %v1139_v40  ;;  %1329 = vrot.lane.b32.xlu1 %v3564_v34, %s2926_s15  ;;  %1475 = vrot.lane.b32.xlu0 %v3564_v34, %s2931_s29 }
 0x1f7   : > { %1283 = vrot.lane.b32.xlu2 %v3564_v34, %s2927_s22  ;;  %v1102_v0 = vpop.f32.mrf.mxu1 }
 0x1f8   : > { %v1177_v43 = vadd.f32 %v1176_v37, %v1158_v24  ;;  %v1103_v1 = vadd.f32 %v1102_v0, %v1084_v31  ;;  %v3760_v37 = vperm.slane %v2463_v32, 1 }
 0x1fa   : > { %v3578_v38 = vmax.f32 %v1177_v43, 0.0  ;;  %v1122_v51 = vadd.f32 %v1121_v59, %v1103_v1 }
 0x1fc   : > { %v1375_v49 = vpack.c.bf16 %v3578_v38, %v3576_v47  ;;  %v1187_v5 = vmax.f32 %v1122_v51, 0.0  ;;  %v2464_v51 = vld [vmem:[%s4206_s1 + $0xe] sm:$0x3] }
 0x1fd   : > { %v1159_v3 = vpop.f32.mrf.mxu2 }
 0x1fe   : > { %1379 = vst [vmem:[#allocation2 + $0x90] sm:$0xff] %v1375_v49  ;;  %v1160_v4 = vadd.f32 %v1159_v3, %v1141_v48  ;;  %1429 = vrot.lane.b32.xlu1 %v3564_v34, %s2932_s11  ;;  %1237 = vrot.lane.b32.xlu0 %v3564_v34, %s4236_s24  ;;  %v1611_v49 = vld [vmem:[%s4210_s5 + $0x10] sm:$0xff] }
 0x1ff   : > { %1383 = vrot.lane.b32.xlu2 %v3564_v34, %s2933_s26 }
 0x200   : > { %v1179_v6 = vadd.f32 %v1178_v2, %v1160_v4 }
 0x202   : > { %v3588_v7 = vmax.f32 %v1179_v6, 0.0  ;;  %v3796_v6 = vperm.slane %v2464_v51, 1 }
 0x204   : > { %v1376_v52 = vpack.c.bf16 %v3588_v7, %v1187_v5 }
 0x206   : > { %1380 = vst [vmem:[#allocation2 + $0x98] sm:$0xff] %v1376_v52  ;;  %1331 = vrot.lane.b32.xlu1 %v3576_v47, %s2926_s15  ;;  %1239 = vrot.lane.b32.xlu0 %v3576_v47, %s4236_s24 }
 0x207   : > { %1477 = vrot.lane.b32.xlu2 %v3576_v47, %s2931_s29 }
 0x20e   : > { %1431 = vrot.lane.b32.xlu1 %v3576_v47, %s2932_s11  ;;  %1287 = vrot.lane.b32.xlu0 %v1187_v5, %s2927_s22 }
 0x20f   : > { %1285 = vrot.lane.b32.xlu2 %v3576_v47, %s2927_s22 }
 0x216   : > { %1479 = vrot.lane.b32.xlu1 %v1187_v5, %s2931_s29  ;;  %1387 = vrot.lane.b32.xlu0 %v1187_v5, %s2933_s26 }
 0x217   : > { %1385 = vrot.lane.b32.xlu2 %v3576_v47, %s2933_s26 }
 0x21e   : > { %1241 = vrot.lane.b32.xlu1 %v1187_v5, %s4236_s24  ;;  %1289 = vrot.lane.b32.xlu0 %v3554_v25, %s2927_s22 }
 0x21f   : > { %1333 = vrot.lane.b32.xlu2 %v1187_v5, %s2926_s15 }
 0x226   : > { %1389 = vrot.lane.b32.xlu0 %v3554_v25, %s2933_s26  ;;  %1481 = vrot.lane.b32.xlu1 %v3554_v25, %s2931_s29 }
 0x227   : > { %1433 = vrot.lane.b32.xlu2 %v1187_v5, %s2932_s11 }
 0x22e   : > { %1337 = vrot.lane.b32.xlu0 %v3566_v36, %s2926_s15  ;;  %1243 = vrot.lane.b32.xlu1 %v3554_v25, %s4236_s24 }
 0x22f   : > { %1335 = vrot.lane.b32.xlu2 %v3554_v25, %s2926_s15 }
 0x236   : > { %1437 = vrot.lane.b32.xlu0 %v3566_v36, %s2932_s11  ;;  %1291 = vrot.lane.b32.xlu1 %v3566_v36, %s2927_s22 }
 0x237   : > { %1435 = vrot.lane.b32.xlu2 %v3554_v25, %s2932_s11 }
 0x23e   : > { %1339 = vrot.lane.b32.xlu0 %v3578_v38, %s2926_s15  ;;  %1391 = vrot.lane.b32.xlu1 %v3566_v36, %s2933_s26 }
 0x23f   : > { %1483 = vrot.lane.b32.xlu2 %v3566_v36, %s2931_s29 }
 0x241   : > { %v3633_v53 = vpop.permute.xlu2 %1473 }
 0x246   : > { %1439 = vrot.lane.b32.xlu0 %v3578_v38, %s2932_s11  ;;  %1293 = vrot.lane.b32.xlu1 %v3578_v38, %s2927_s22 }
 0x247   : > { %1245 = vrot.lane.b32.xlu2 %v3566_v36, %s4236_s24 }
 0x249   : > { %v3641_v42 = vpop.permute.xlu2 %1235 }
 0x24e   : > { %1487 = vrot.lane.b32.xlu0 %v3588_v7, %s2931_s29  ;;  %1393 = vrot.lane.b32.xlu1 %v3578_v38, %s2933_s26 }
 0x24f   : > { %1485 = vrot.lane.b32.xlu2 %v3578_v38, %s2931_s29 }
 0x251   : > { %v3649_v26 = vpop.permute.xlu2 %1283 }
 0x256   : > { %1193 = vrot.lane.b32.xlu0 %v3576_v47, %s4237_s19  ;;  %1341 = vrot.lane.b32.xlu1 %v3588_v7, %s2926_s15  ;;  %s4238_s15 = smov 111  }
 0x257   : > { %1247 = vrot.lane.b32.xlu2 %v3578_v38, %s4236_s24 }
 0x258   : > { %v3657_v50 = vpop.permute.xlu1 %1281  ;;  %v1328_v55 = vpop.permute.xlu0 %1327 }
 0x259   : > { %v3659_v41 = vpop.permute.xlu2 %1383 }
 0x25e   : > { %1249 = vrot.lane.b32.xlu0 %v3588_v7, %s4236_s24  ;;  %1441 = vrot.lane.b32.xlu1 %v3588_v7, %s2932_s11  ;;  %s2195_s11 = sshll.u32 %s4148_s27, 4  ;;  %s2196_s11 = int_to_ptr.vmem [resolvable:$true] %s2195_s11 }
 0x25f   : > { %1295 = vrot.lane.b32.xlu2 %v3588_v7, %s2927_s22 }
 0x260   : > { %v3667_v56 = vpop.permute.xlu1 %1381  ;;  %v1428_v57 = vpop.permute.xlu0 %1427 }
 0x261   : > { %v3669_v58 = vpop.permute.xlu2 %1477 }
 0x266   : > { %1203 = vrot.lane.b32.xlu0 %v3588_v7, %s4237_s19  ;;  %1195 = vrot.lane.b32.xlu1 %v1187_v5, %s4237_s19 }
 0x267   : > { %1395 = vrot.lane.b32.xlu2 %v3588_v7, %s2933_s26 }
 0x268   : > { %v3676_v59 = vpop.permute.xlu1 %1329  ;;  %v3678_v60 = vpop.permute.xlu0 %1475 }
 0x269   : > { %v3680_v63 = vpop.permute.xlu2 %1285 }
 0x26e   : > { %1197 = vrot.lane.b32.xlu0 %v3554_v25, %s4237_s19  ;;  %1189 = vrot.lane.b32.xlu1 %v3546_v61, %s4237_s19 }
 0x26f   : > { %1201 = vrot.lane.b32.xlu2 %v3578_v38, %s4237_s19 }
 0x270   : > { %v3688_v9 = vpop.permute.xlu1 %1429  ;;  %v3690_v54 = vpop.permute.xlu0 %1237 }
 0x271   : > { %v3692_v10 = vpop.permute.xlu2 %1385 }
 0x276   : > { %1525 = vrot.lane.b32.xlu0 %v1187_v5, %s4238_s15  ;;  %1199 = vrot.lane.b32.xlu1 %v3566_v36, %s4237_s19  ;;  %v3794_v5 = vperm.slane %v2464_v51, 0 }
 0x277   : > { %1191 = vrot.lane.b32.xlu2 %v3564_v34, %s4237_s19  ;;  %s2737_s19 = sshll.u32 %s3013_s17, 6  ;;  %s2183_s17 = scalar_lea.sflag [#allocation5], %s3078_s18 }
 0x278   : > { %v3699_v13 = vpop.permute.xlu1 %1331  ;;  %v3701_v15 = vpop.permute.xlu0 %1239  ;;  %s2194_s29 = scalar_lea.hbm %s4215_s10, %s2737_s19 }
 0x279   : > { %v3703_v16 = vpop.permute.xlu2 %1333  ;;  %s2197_s26 = sshll.u32 %s2194_s29, 4  ;;  %s2198_s26 = int_to_ptr.hbm [resolvable:$true] %s2197_s26 }
 0x27a   : > { %s2870_s20 = sshra.s32 %s2198_s26, 4  ;;  %s2871_s20 = int_to_ptr.hbm [resolvable:$true] %s2870_s20 }
 0x27b   : > { %s2872_s21 = scalar_lea.hbm %s2871_s20, 64  ;;  %p2877_p0 = scmp.lt.s32.totalorder %s2871_s20, %s4215_s10 }
 0x27c   : > { %p2873_p6 = scmp.ne.s32.totalorder %s2871_s20, %s2872_s21  ;;  %p2878_p1 = scmp.lt.s32.totalorder %s2876_s30, %s2872_s21 }
 0x27e   : > { %1519 = vrot.lane.b32.xlu0 %v3546_v61, %s4238_s15  ;;  %1531 = vrot.lane.b32.xlu1 %v3578_v38, %s4238_s15  ;;  %v3726_v61 = vperm.slane %v2461_v19, 0  ;;  %v2462_v38 = vld [vmem:[%s4206_s1 + $0xa] sm:$0x3]  ;;  %p2874_p9 = pnand %p2873_p6, %p3042_p11  ;;  %p2879_p3 = por %p2878_p1, %p2877_p0 }
 0x27f   : > { %1523 = vrot.lane.b32.xlu2 %v3576_v47, %s4238_s15  ;;  %v1609_v47 = vld [vmem:[%s4210_s5] sm:$0xff]  ;;  %v3790_v2 = vperm.slane %v2462_v38, 0  ;;  %v3792_v4 = vperm.slane %v2462_v38, 1 }
 0x280   : > { %v3711_v17 = vpop.permute.xlu1 %1431  ;;  %v3713_v18 = vpop.permute.xlu0 %1287  ;;  %p2875_p13 = pneg %p2874_p9 }
 0x281   : > { %v3715_v62 = vpop.permute.xlu2 %1433 }
 0x282   : > { %p2880_p4 = pnand %p2879_p3, %p2875_p13 }
 0x286   : > { %1529 = vrot.lane.b32.xlu0 %v3566_v36, %s4238_s15  ;;  %1521 = vrot.lane.b32.xlu1 %v3564_v34, %s4238_s15  ;;  %v3752_v34 = vperm.slane %v2460_v30, 0  ;;  %v3758_v36 = vperm.slane %v2463_v32, 0  ;;  %v2459_v32 = vld [vmem:[%s4206_s1 + $0x2] sm:$0x3] }
 0x287   : > { %1533 = vrot.lane.b32.xlu2 %v3588_v7, %s4238_s15 }
 0x288   : > { %v3730_v22 = vpop.permute.xlu1 %1479  ;;  %v3732_v23 = vpop.permute.xlu0 %1387 }
 0x289   : > { %v1336_v14 = vpop.permute.xlu2 %1335 }
 0x28a   : > { %v1343_v12 = vsel %vm550_vm0, %v1328_v55, %v1336_v14  ;;  %v1347_v8 = vsel %vm550_vm0, %v1336_v14, %v1328_v55 }
 0x28b   : > { %v1357_v27 = vmul.f32 %v3726_v61, %v1347_v8  ;;  %v1358_v28 = vmul.f32 %v3728_v20, %v1343_v12 }
 0x28d   : > { %v1365_v33 = vpack.c.bf16 %v1358_v28, %v1357_v27 }
 0x28e   : > { %1620 = vperm.xlu0 %2799, %v1610_v21   ;;  %1630 = vperm.xlu1 %2797, %v1612_v29  }
 0x28f   : > { %1369 = vst [vmem:[#allocation2 + $0x60] sm:$0xff] %v1365_v33  ;;  %1527 = vrot.lane.b32.xlu2 %v3554_v25, %s4238_s15 }
 0x290   : > { %v3762_v40 = vpop.permute.xlu1 %1241  ;;  %v1290_v44 = vpop.permute.xlu0 %1289 }
 0x291   : > { %v1297_v31 = vsel %vm502_vm1, %v3657_v50, %v1290_v44  ;;  %v1301_v39 = vsel %vm502_vm1, %v1290_v44, %v3657_v50  ;;  %v1436_v45 = vpop.permute.xlu2 %1435 }
 0x292   : > { %v1311_v24 = vmul.f32 %v3752_v34, %v1301_v39  ;;  %v1312_v25 = vmul.f32 %v3754_v35, %v1297_v31  ;;  %v1443_v46 = vsel %vm654_vm6, %v1428_v57, %v1436_v45  ;;  %v1447_v0 = vsel %vm654_vm6, %v1436_v45, %v1428_v57 }
 0x293   : > { %v1457_v43 = vmul.f32 %v3758_v36, %v1443_v46  ;;  %v1458_v1 = vmul.f32 %v3760_v37, %v1447_v0  ;;  %v3825_v31 = vperm.slane %v2459_v32, 0 }
 0x294   : > { %v1319_v48 = vpack.c.bf16 %v1312_v25, %v1311_v24 }
 0x295   : > { %v1465_v3 = vpack.c.bf16 %v1458_v1, %v1457_v43 }
 0x296   : > { %1323 = vst [vmem:[#allocation2 + $0x40] sm:$0xff] %v1319_v48  ;;  %1615 = vperm.xlu1 %2797, %v1609_v47  }
 0x297   : > { %1469 = vst [vmem:[#allocation2 + $0xc0] sm:$0xff] %v1465_v3  ;;  %1625 = vperm.xlu2 %2798, %v1611_v49  }
 0x298   : > { %v1390_v7 = vpop.permute.xlu0 %1389  ;;  %v1482_v52 = vpop.permute.xlu1 %1481 }
 0x299   : > { %v1397_v50 = vsel %vm606_vm8, %v3667_v56, %v1390_v7  ;;  %v1401_v55 = vsel %vm606_vm8, %v1390_v7, %v3667_v56  ;;  %v1484_v57 = vpop.permute.xlu2 %1483  ;;  %v1489_v19 = vsel %vm702_vm5, %v3633_v53, %v1482_v52  ;;  %v1493_v14 = vsel %vm702_vm5, %v1482_v52, %v3633_v53 }
 0x29a   : > { %v1411_v12 = vmul.f32 %v3790_v2, %v1397_v50  ;;  %v1412_v8 = vmul.f32 %v3792_v4, %v1401_v55  ;;  %v1490_v27 = vsel %vm702_vm5, %v3678_v60, %v1484_v57  ;;  %v1494_v56 = vsel %vm702_vm5, %v1484_v57, %v3678_v60 }
 0x29b   : > { %v1505_v28 = vmul.f32 %v3794_v5, %v1490_v27  ;;  %v1506_v21 = vmul.f32 %v3796_v6, %v1494_v56  ;;  %v1503_v29 = vmul.f32 %v3794_v5, %v1489_v19  ;;  %v1504_v53 = vmul.f32 %v3796_v6, %v1493_v14 }
 0x29c   : > { %v1419_v30 = vpack.c.bf16 %v1412_v8, %v1411_v12  ;;  %v3827_v60 = vperm.slane %v2459_v32, 1 }
 0x29d   : > { %v1512_v33 = vpack.c.bf16 %v1506_v21, %v1505_v28  ;;  %v1511_v44 = vpack.c.bf16 %v1504_v53, %v1503_v29 }
 0x29e   : > { %1423 = vst [vmem:[#allocation2 + $0xa0] sm:$0xff] %v1419_v30 }
 0x29f   : > { %1516 = vst [vmem:[#allocation2 + $0xe8] sm:$0xff] %v1512_v33 }
 0x2a0   : > { %1515 = vst [vmem:[#allocation2 + $0xe0] sm:$0xff] %v1511_v44  ;;  %v1338_v39 = vpop.permute.xlu0 %1337  ;;  %v1244_v45 = vpop.permute.xlu1 %1243 }
 0x2a1   : > { %v1344_v24 = vsel %vm550_vm0, %v3676_v59, %v1338_v39  ;;  %v1348_v25 = vsel %vm550_vm0, %v1338_v39, %v3676_v59  ;;  %v1246_v46 = vpop.permute.xlu2 %1245  ;;  %v1251_v0 = vsel %vm454_vm2, %v3641_v42, %v1244_v45  ;;  %v1255_v43 = vsel %vm454_vm2, %v1244_v45, %v3641_v42 }
 0x2a2   : > { %v1359_v1 = vmul.f32 %v3726_v61, %v1348_v25  ;;  %v1360_v47 = vmul.f32 %v3728_v20, %v1344_v24  ;;  %v1252_v38 = vsel %vm454_vm2, %v3690_v54, %v1246_v46  ;;  %v1256_v59 = vsel %vm454_vm2, %v1246_v46, %v3690_v54 }
 0x2a3   : > { %v1267_v48 = vmul.f32 %v3825_v31, %v1256_v59  ;;  %v1268_v49 = vmul.f32 %v3827_v60, %v1252_v38  ;;  %v1265_v51 = vmul.f32 %v3825_v31, %v1255_v43  ;;  %v1266_v42 = vmul.f32 %v3827_v60, %v1251_v0 }
 0x2a4   : > { %v1366_v3 = vpack.c.bf16 %v1360_v47, %v1359_v1 }
 0x2a5   : > { %v1274_v7 = vpack.c.bf16 %v1268_v49, %v1267_v48  ;;  %v1273_v52 = vpack.c.bf16 %v1266_v42, %v1265_v51 }
 0x2a6   : > { %1370 = vst [vmem:[#allocation2 + $0x68] sm:$0xff] %v1366_v3 }
 0x2a7   : > { %1278 = vst [vmem:[#allocation2 + $0x28] sm:$0xff] %v1274_v7 }
 0x2a8   : > { %1277 = vst [vmem:[#allocation2 + $0x20] sm:$0xff] %v1273_v52  ;;  %v1438_v50 = vpop.permute.xlu0 %1437  ;;  %v1292_v55 = vpop.permute.xlu1 %1291 }
 0x2a9   : > { %v1444_v54 = vsel %vm654_vm6, %v3688_v9, %v1438_v50  ;;  %v1448_v57 = vsel %vm654_vm6, %v1438_v50, %v3688_v9  ;;  %v1486_v19 = vpop.permute.xlu2 %1485  ;;  %v1298_v14 = vsel %vm502_vm1, %v3649_v26, %v1292_v55  ;;  %v1302_v12 = vsel %vm502_vm1, %v1292_v55, %v3649_v26 }
 0x2aa   : > { %v1459_v8 = vmul.f32 %v3758_v36, %v1444_v54  ;;  %v1460_v27 = vmul.f32 %v3760_v37, %v1448_v57  ;;  %v1491_v56 = vsel %vm702_vm5, %v3669_v58, %v1486_v19  ;;  %v1495_v9 = vsel %vm702_vm5, %v1486_v19, %v3669_v58 }
 0x2ab   : > { %v1507_v28 = vmul.f32 %v3794_v5, %v1491_v56  ;;  %v1508_v21 = vmul.f32 %v3796_v6, %v1495_v9  ;;  %v1313_v29 = vmul.f32 %v3752_v34, %v1302_v12  ;;  %v1314_v26 = vmul.f32 %v3754_v35, %v1298_v14 }
 0x2ac   : > { %v1466_v53 = vpack.c.bf16 %v1460_v27, %v1459_v8 }
 0x2ad   : > { %v1513_v30 = vpack.c.bf16 %v1508_v21, %v1507_v28  ;;  %v1320_v32 = vpack.c.bf16 %v1314_v26, %v1313_v29 }
 0x2ae   : > { %1470 = vst [vmem:[#allocation2 + $0xc8] sm:$0xff] %v1466_v53 }
 0x2af   : > { %1517 = vst [vmem:[#allocation2 + $0xf0] sm:$0xff] %v1513_v30 }
 0x2b0   : > { %1324 = vst [vmem:[#allocation2 + $0x48] sm:$0xff] %v1320_v32  ;;  %v1340_v33 = vpop.permute.xlu0 %1339  ;;  %v1392_v44 = vpop.permute.xlu1 %1391 }
 0x2b1   : > { %v1345_v58 = vsel %vm550_vm0, %v3699_v13, %v1340_v33  ;;  %v1349_v39 = vsel %vm550_vm0, %v1340_v33, %v3699_v13  ;;  %v1248_v45 = vpop.permute.xlu2 %1247  ;;  %v1398_v24 = vsel %vm606_vm8, %v3659_v41, %v1392_v44  ;;  %v1402_v25 = vsel %vm606_vm8, %v1392_v44, %v3659_v41 }
 0x2b2   : > { %v1361_v46 = vmul.f32 %v3726_v61, %v1349_v39  ;;  %v1362_v0 = vmul.f32 %v3728_v20, %v1345_v58  ;;  %v1253_v43 = vsel %vm454_vm2, %v3701_v15, %v1248_v45  ;;  %v1257_v13 = vsel %vm454_vm2, %v1248_v45, %v3701_v15 }
 0x2b3   : > { %v1269_v1 = vmul.f32 %v3825_v31, %v1257_v13  ;;  %v1270_v47 = vmul.f32 %v3827_v60, %v1253_v43  ;;  %v1413_v38 = vmul.f32 %v3790_v2, %v1398_v24  ;;  %v1414_v41 = vmul.f32 %v3792_v4, %v1402_v25 }
 0x2b4   : > { %v1367_v59 = vpack.c.bf16 %v1362_v0, %v1361_v46 }
 0x2b5   : > { %v1275_v48 = vpack.c.bf16 %v1270_v47, %v1269_v1  ;;  %v1420_v49 = vpack.c.bf16 %v1414_v41, %v1413_v38 }
 0x2b6   : > { %1371 = vst [vmem:[#allocation2 + $0x70] sm:$0xff] %v1367_v59  ;;  %v2730_v59 = vld [vmem:[#allocation2 + $0xe4] sm:$0xf0] }
 0x2b7   : > { %1279 = vst [vmem:[#allocation2 + $0x30] sm:$0xff] %v1275_v48 }
 0x2b8   : > { %1424 = vst [vmem:[#allocation2 + $0xa8] sm:$0xff] %v1420_v49  ;;  %v1440_v51 = vpop.permute.xlu0 %1439  ;;  %v1294_v42 = vpop.permute.xlu1 %1293  ;;  %v2612_v49 = vld [vmem:[#allocation2 + $0xf0] sm:$0xf] }
 0x2b9   : > { %v1445_v15 = vsel %vm654_vm6, %v3711_v17, %v1440_v51  ;;  %v1449_v3 = vsel %vm654_vm6, %v1440_v51, %v3711_v17  ;;  %v1296_v7 = vpop.permute.xlu2 %1295  ;;  %v1299_v52 = vsel %vm502_vm1, %v3680_v63, %v1294_v42  ;;  %v1303_v50 = vsel %vm502_vm1, %v1294_v42, %v3680_v63 }
 0x2ba   : > { %v1461_v55 = vmul.f32 %v3758_v36, %v1445_v15  ;;  %v1462_v54 = vmul.f32 %v3760_v37, %v1449_v3  ;;  %v1300_v57 = vsel %vm502_vm1, %v3713_v18, %v1296_v7  ;;  %v1304_v17 = vsel %vm502_vm1, %v1296_v7, %v3713_v18 }
 0x2bb   : > { %v1317_v19 = vmul.f32 %v3752_v34, %v1304_v17  ;;  %v1318_v14 = vmul.f32 %v3754_v35, %v1300_v57  ;;  %v1315_v12 = vmul.f32 %v3752_v34, %v1303_v50  ;;  %v1316_v63 = vmul.f32 %v3754_v35, %v1299_v52 }
 0x2bc   : > { %v1467_v8 = vpack.c.bf16 %v1462_v54, %v1461_v55 }
 0x2bd   : > { %v1322_v27 = vpack.c.bf16 %v1318_v14, %v1317_v19  ;;  %v1321_v56 = vpack.c.bf16 %v1316_v63, %v1315_v12  ;;  %v2548_v12 = vld [vmem:[#allocation2 + $0x70] sm:$0xf] }
 0x2be   : > { %1471 = vst [vmem:[#allocation2 + $0xd0] sm:$0xff] %v1467_v8  ;;  %v2715_v8 = vld [vmem:[#allocation2 + $0x74] sm:$0xf] }
 0x2bf   : > { %1326 = vst [vmem:[#allocation2 + $0x58] sm:$0xff] %v1322_v27 }
 0x2c0   : > { %1325 = vst [vmem:[#allocation2 + $0x50] sm:$0xff] %v1321_v56  ;;  %v1488_v9 = vpop.permute.xlu0 %1487  ;;  %v1394_v28 = vpop.permute.xlu1 %1393 }
 0x2c1   : > { %v1492_v18 = vsel %vm702_vm5, %v3730_v22, %v1488_v9  ;;  %v1496_v21 = vsel %vm702_vm5, %v1488_v9, %v3730_v22  ;;  %v1396_v29 = vpop.permute.xlu2 %1395  ;;  %v1399_v34 = vsel %vm606_vm8, %v3692_v10, %v1394_v28  ;;  %v1403_v35 = vsel %vm606_vm8, %v1394_v28, %v3692_v10  ;;  %v2542_v28 = vld [vmem:[#allocation2 + $0x68] sm:$0xf0] }
 0x2c2   : > { %v1509_v26 = vmul.f32 %v3794_v5, %v1492_v18  ;;  %v1510_v53 = vmul.f32 %v3796_v6, %v1496_v21  ;;  %v1400_v30 = vsel %vm606_vm8, %v3732_v23, %v1396_v29  ;;  %v1404_v22 = vsel %vm606_vm8, %v1396_v29, %v3732_v23  ;;  %v1213_v5 = vld [vmem:[%s4206_s1] sm:$0x3]  ;;  %v2713_v21 = vld [vmem:[#allocation2 + $0x64] sm:$0xf] }
 0x2c3   : > { %v1417_v32 = vmul.f32 %v3790_v2, %v1400_v30  ;;  %v1418_v33 = vmul.f32 %v3792_v4, %v1404_v22  ;;  %v1415_v44 = vmul.f32 %v3790_v2, %v1399_v34  ;;  %v1416_v10 = vmul.f32 %v3792_v4, %v1403_v35  ;;  %v2540_v18 = vld [vmem:[#allocation2 + $0x60] sm:$0xf] }
 0x2c4   : > { %v1514_v58 = vpack.c.bf16 %v1510_v53, %v1509_v26  ;;  %v3952_v45 = vperm.slane %v1213_v5, 0  ;;  %v3954_v23 = vperm.slane %v1213_v5, 1  ;;  %v2545_v26 = vor.u32 %v2713_v21, %v2542_v28 }
 0x2c5   : > { %v1422_v6 = vpack.c.bf16 %v1418_v33, %v1417_v32  ;;  %v1421_v39 = vpack.c.bf16 %v1416_v10, %v1415_v44 }
 0x2c6   : > { %1518 = vst [vmem:[#allocation2 + $0xf8] sm:$0xff] %v1514_v58  ;;  %v2712_v53 = vld [vmem:[#allocation2 + $0x54] sm:$0xf0]  ;;  %v2534_v33 = vld [vmem:[#allocation2 + $0x58] sm:$0xf0] }
 0x2c7   : > { %1426 = vst [vmem:[#allocation2 + $0xb8] sm:$0xff] %v1422_v6  ;;  %v2532_v22 = vld [vmem:[#allocation2 + $0x50] sm:$0xf]  ;;  %v2711_v32 = vld [vmem:[#allocation2 + $0x54] sm:$0xf] }
 0x2c8   : > { %1425 = vst [vmem:[#allocation2 + $0xb0] sm:$0xff] %v1421_v39  ;;  %v1194_v24 = vpop.permute.xlu0 %1193  ;;  %v1342_v25 = vpop.permute.xlu1 %1341  ;;  %v2533_v10 = vor.u32 %v2712_v53, %v2532_v22  ;;  %v2596_v58 = vld [vmem:[#allocation2 + $0xd0] sm:$0xf]  ;;  %v2537_v6 = vor.u32 %v2711_v32, %v2534_v33  ;;  %v2720_v33 = vld [vmem:[#allocation2 + $0x94] sm:$0xf0] }
 0x2c9   : > { %v1202_v46 = vpop.permute.xlu2 %1201  ;;  %v1346_v2 = vsel %vm550_vm0, %v3703_v16, %v1342_v25  ;;  %v1350_v4 = vsel %vm550_vm0, %v1342_v25, %v3703_v16  ;;  %v2604_v16 = vld [vmem:[#allocation2 + $0xe0] sm:$0xf]  ;;  %v2526_v25 = vld [vmem:[#allocation2 + $0x48] sm:$0xf0] }
 0x2ca   : > { %v1207_v0 = vsel %vm407_vm4, %v1194_v24, %v1202_v46  ;;  %v1211_v43 = vsel %vm407_vm4, %v1202_v46, %v1194_v24  ;;  %v1363_v13 = vmul.f32 %v3726_v61, %v1350_v4  ;;  %v1364_v1 = vmul.f32 %v3728_v20, %v1346_v2  ;;  %v2710_v24 = vld [vmem:[#allocation2 + $0x44] sm:$0xf0] }
 0x2cb   : > { %v1223_v47 = vmul.f32 %v3952_v45, %v1211_v43  ;;  %v1224_v38 = vmul.f32 %v3954_v23, %v1207_v0  ;;  %v2605_v7 = vor.u32 %v2730_v59, %v2604_v16  ;;  %v2726_v4 = vld [vmem:[#allocation2 + $0xc4] sm:$0xf0]  ;;  %v2588_v59 = vld [vmem:[#allocation2 + $0xc0] sm:$0xf] }
 0x2cc   : > { %v1368_v41 = vpack.c.bf16 %v1364_v1, %v1363_v13  ;;  %v2524_v13 = vld [vmem:[#allocation2 + $0x40] sm:$0xf]  ;;  %v2709_v1 = vld [vmem:[#allocation2 + $0x44] sm:$0xf] }
 0x2cd   : > { %v1229_v48 = vpack.c.bf16 %v1224_v38, %v1223_v47  ;;  %v2732_v51 = vld [vmem:[#allocation2 + $0xf4] sm:$0xf0] }
 0x2ce   : > { %1372 = vst [vmem:[#allocation2 + $0x78] sm:$0xff] %v1368_v41  ;;  %v2613_v42 = vor.u32 %v2732_v51, %v2612_v49  ;;  %v2525_v41 = vor.u32 %v2710_v24, %v2524_v13  ;;  %v2589_v49 = vor.u32 %v2726_v4, %v2588_v59  ;;  %v2465_v51 = vld [vmem:[%s4206_s1 + $0x10] sm:$0x3]  ;;  %v2718_v24 = vld [vmem:[#allocation2 + $0x84] sm:$0xf0] }
 0x2cf   : > { %1233 = vst [vmem:[#allocation2 + $0x10] sm:$0xff] %v1229_v48  ;;  %v2529_v48 = vor.u32 %v2709_v1, %v2526_v25 }
 0x2d0   : > { %v1250_v15 = vpop.permute.xlu0 %1249  ;;  %1868 = vmatpush.bf16.msrb.mxu3 %v2613_v42  ;;  %v1442_v3 = vpop.permute.xlu1 %1441 }
 0x2d1   : > { %v1254_v61 = vsel %vm454_vm2, %v3762_v40, %v1250_v15  ;;  %v1258_v20 = vsel %vm454_vm2, %v1250_v15, %v3762_v40  ;;  %v3976_v52 = vpop.permute.xlu2 %1191  ;;  %v1446_v50 = vsel %vm654_vm6, %v3715_v62, %v1442_v3  ;;  %v1450_v55 = vsel %vm654_vm6, %v1442_v3, %v3715_v62  ;;  %v2714_v62 = vld [vmem:[#allocation2 + $0x64] sm:$0xf0]  ;;  %v2510_v3 = vld [vmem:[#allocation2 + $0x28] sm:$0xf0] }
 0x2d2   : > { %v1271_v54 = vmul.f32 %v3825_v31, %v1258_v20  ;;  %v1272_v57 = vmul.f32 %v3827_v60, %v1254_v61  ;;  %v1463_v17 = vmul.f32 %v3758_v36, %v1446_v50  ;;  %v1464_v19 = vmul.f32 %v3760_v37, %v1450_v55  ;;  %v2706_v15 = vld [vmem:[#allocation2 + $0x24] sm:$0xf0]  ;;  %v2580_v61 = vld [vmem:[#allocation2 + $0xb0] sm:$0xf]  ;;  %v2724_v20 = vld [vmem:[#allocation2 + $0xb4] sm:$0xf0] }
 0x2d3   : > { %v2541_v35 = vor.u32 %v2714_v62, %v2540_v18  ;;  %v2508_v50 = vld [vmem:[#allocation2 + $0x20] sm:$0xf] }
 0x2d4   : > { %v1276_v14 = vpack.c.bf16 %v1272_v57, %v1271_v54  ;;  %v1468_v40 = vpack.c.bf16 %v1464_v19, %v1463_v17  ;;  %1869 = vmatpush.bf16.msrb.mxu3 %v2605_v7  ;;  %v2516_v54 = vld [vmem:[#allocation2 + $0x30] sm:$0xf]  ;;  %v2707_v57 = vld [vmem:[#allocation2 + $0x34] sm:$0xf]  ;;  %v2705_v17 = vld [vmem:[#allocation2 + $0x24] sm:$0xf] }
 0x2d5   : > { %v2716_v63 = vld [vmem:[#allocation2 + $0x74] sm:$0xf0]  ;;  %v2550_v27 = vld [vmem:[#allocation2 + $0x78] sm:$0xf0]  ;;  %v4005_v19 = vperm.slane %v2465_v51, 0  ;;  %v2513_v62 = vor.u32 %v2705_v17, %v2510_v3 }
 0x2d6   : > { %1280 = vst [vmem:[#allocation2 + $0x38] sm:$0xff] %v1276_v14  ;;  %v2549_v56 = vor.u32 %v2716_v63, %v2548_v12  ;;  %v2553_v9 = vor.u32 %v2715_v8, %v2550_v27  ;;  %v4007_v14 = vperm.slane %v2465_v51, 1  ;;  %v2581_v63 = vor.u32 %v2724_v20, %v2580_v61  ;;  %v2614_v51 = vld [vmem:[#allocation2 + $0xf8] sm:$0xf0]  ;;  %v2696_v3 = vld [vmem:[%s4209_s4 + $0x8] sm:$0xf0] }
 0x2d7   : > { %1472 = vst [vmem:[#allocation2 + $0xd8] sm:$0xff] %v1468_v40 }
 0x2d8   : > { %v1204_v31 = vpop.permute.xlu0 %1203  ;;  %1849 = vmatpush.bf16.msrb.mxu1 %v2549_v56  ;;  %1906 = vmatpush.bf16.msra.mxu0 %v2553_v9  ;;  %v1196_v60 = vpop.permute.xlu1 %1195  ;;  %v2509_v56 = vor.u32 %v2706_v15, %v2508_v50  ;;  %v2722_v9 = vld [vmem:[#allocation2 + $0xa4] sm:$0xf0] }
 0x2d9   : > { %v1208_v36 = vsel %vm407_vm4, %v1196_v60, %v1204_v31  ;;  %v1212_v37 = vsel %vm407_vm4, %v1204_v31, %v1196_v60  ;;  %v3994_v30 = vpop.permute.xlu2 %1523 }
 0x2da   : > { %v1225_v29 = vmul.f32 %v3952_v45, %v1212_v37  ;;  %v1226_v34 = vmul.f32 %v3954_v23, %v1208_v36 }
 0x2dc   : > { %v1230_v44 = vpack.c.bf16 %v1226_v34, %v1225_v29  ;;  %1850 = vmatpush.bf16.msrb.mxu1 %v2541_v35  ;;  %1907 = vmatpush.bf16.msra.mxu0 %v2545_v26  ;;  %v2572_v34 = vld [vmem:[#allocation2 + $0xa0] sm:$0xf] }
 0x2dd   : > { %v2708_v16 = vld [vmem:[#allocation2 + $0x34] sm:$0xf0]  ;;  %v2518_v42 = vld [vmem:[#allocation2 + $0x38] sm:$0xf0]  ;;  %v2573_v35 = vor.u32 %v2722_v9, %v2572_v34 }
 0x2de   : > { %1234 = vst [vmem:[#allocation2 + $0x18] sm:$0xff] %v1230_v44  ;;  %v2728_v5 = vld [vmem:[#allocation2 + $0xd4] sm:$0xf0]  ;;  %v2517_v40 = vor.u32 %v2708_v16, %v2516_v54  ;;  %v2521_v12 = vor.u32 %v2707_v57, %v2518_v42  ;;  %v2500_v44 = vld [vmem:[#allocation2 + $0x10] sm:$0xf] }
 0x2df   : > { %v2597_v39 = vor.u32 %v2728_v5, %v2596_v58  ;;  %v2564_v58 = vld [vmem:[#allocation2 + $0x90] sm:$0xf]  ;;  %v2468_v16 = vld [vmem:[%s4209_s4] sm:$0xf] }
 0x2e0   : > { %v1198_v46 = vpop.permute.xlu0 %1197  ;;  %1851 = vmatpush.bf16.msrb.mxu1 %v2533_v10  ;;  %1908 = vmatpush.bf16.msra.mxu0 %v2537_v6  ;;  %v1190_v2 = vpop.permute.xlu1 %1189 }
 0x2e1   : > { %1870 = vmatpush.bf16.msrb.mxu3 %v2597_v39  ;;  %v1205_v0 = vsel %vm407_vm4, %v1190_v2, %v1198_v46  ;;  %v1209_v43 = vsel %vm407_vm4, %v1198_v46, %v1190_v2  ;;  %v1534_v55 = vpop.permute.xlu2 %1533 }
 0x2e2   : > { %v1219_v47 = vmul.f32 %v3952_v45, %v1209_v43  ;;  %v1220_v38 = vmul.f32 %v3954_v23, %v1205_v0  ;;  %v2695_v0 = vld [vmem:[%s4209_s4 + $0x4] sm:$0xf]  ;;  %v2470_v43 = vld [vmem:[%s4209_s4 + $0xc] sm:$0xf0] }
 0x2e4   : > { %v1227_v7 = vpack.c.bf16 %v1220_v38, %v1219_v47  ;;  %1852 = vmatpush.bf16.msrb.mxu1 %v2525_v41  ;;  %1909 = vmatpush.bf16.msra.mxu0 %v2529_v48  ;;  %v2556_v41 = vld [vmem:[#allocation2 + $0x80] sm:$0xf] }
 0x2e5   : > { %1871 = vmatpush.bf16.msrb.mxu3 %v2589_v49  ;;  %v2704_v26 = vld [vmem:[#allocation2 + $0x14] sm:$0xf0]  ;;  %v2502_v53 = vld [vmem:[#allocation2 + $0x18] sm:$0xf0]  ;;  %v2557_v59 = vor.u32 %v2718_v24, %v2556_v41  ;;  %v4043_v49 = vor.u32 %v2695_v0, %v2470_v43  ;;  %v2721_v0 = vld [vmem:[#allocation2 + $0xa4] sm:$0xf] }
 0x2e6   : > { %1231 = vst [vmem:[#allocation2] sm:$0xff] %v1227_v7  ;;  %v2501_v10 = vor.u32 %v2704_v26, %v2500_v44  ;;  %v2725_v26 = vld [vmem:[#allocation2 + $0xc4] sm:$0xf] }
 0x2e7   : > { %v2717_v41 = vld [vmem:[#allocation2 + $0x84] sm:$0xf] }
 0x2e8   : > { %v1526_v8 = vpop.permute.xlu0 %1525  ;;  %1853 = vmatpush.bf16.msrb.mxu1 %v2517_v40  ;;  %1910 = vmatpush.bf16.msra.mxu0 %v2521_v12  ;;  %v1200_v27 = vpop.permute.xlu1 %1199  ;;  %v2469_v40 = vor.u32 %v2696_v3, %v2468_v16 }
 0x2e9   : > { %v1538_v28 = vsel %vm750_vm3, %v1526_v8, %v1534_v55  ;;  %v1542_v31 = vsel %vm750_vm3, %v1534_v55, %v1526_v8  ;;  %1872 = vmatpush.bf16.msrb.mxu3 %v2581_v63  ;;  %v1206_v60 = vsel %vm407_vm4, %v3976_v52, %v1200_v27  ;;  %v1210_v36 = vsel %vm407_vm4, %v1200_v27, %v3976_v52  ;;  %v2703_v52 = vld [vmem:[#allocation2 + $0x14] sm:$0xf]  ;;  %v1528_v6 = vpop.permute.xlu2 %1527  ;;  %v2729_v8 = vld [vmem:[#allocation2 + $0xe4] sm:$0xf]  ;;  %v2606_v27 = vld [vmem:[#allocation2 + $0xe8] sm:$0xf0] }
 0x2ea   : > { %v1555_v37 = vmul.f32 %v4005_v19, %v1538_v28  ;;  %v1556_v18 = vmul.f32 %v4007_v14, %v1542_v31  ;;  %v1221_v21 = vmul.f32 %v3952_v45, %v1210_v36  ;;  %v1222_v29 = vmul.f32 %v3954_v23, %v1206_v60  ;;  %v2731_v55 = vld [vmem:[#allocation2 + $0xf4] sm:$0xf]  ;;  %v2598_v36 = vld [vmem:[#allocation2 + $0xd8] sm:$0xf0] }
 0x2eb   : > { %v2505_v5 = vor.u32 %v2703_v52, %v2502_v53  ;;  %v2565_v45 = vor.u32 %v2720_v33, %v2564_v58  ;;  %v2617_v17 = vor.u32 %v2731_v55, %v2614_v51  ;;  %v2609_v28 = vor.u32 %v2729_v8, %v2606_v27  ;;  %v2723_v53 = vld [vmem:[#allocation2 + $0xb4] sm:$0xf]  ;;  %v2699_v33 = vld [vmem:[%s4209_s4 + $0x20] sm:$0xf0]  ;;  %v2476_v58 = vld [vmem:[%s4209_s4 + $0x8] sm:$0xf] }
 0x2ec   : > { %v1560_v22 = vpack.c.bf16 %v1556_v18, %v1555_v37  ;;  %v1228_v32 = vpack.c.bf16 %v1222_v29, %v1221_v21  ;;  %1854 = vmatpush.bf16.msrb.mxu1 %v2509_v56  ;;  %1911 = vmatpush.bf16.msra.mxu0 %v2513_v62  ;;  %v2727_v29 = vld [vmem:[#allocation2 + $0xd4] sm:$0xf] }
 0x2ed   : > { %1873 = vmatpush.bf16.msrb.mxu3 %v2573_v35  ;;  %v2492_v42 = vld [vmem:[#allocation2] sm:$0xf]  ;;  %v2701_v15 = vld [vmem:[#allocation2 + $0x4] sm:$0xf]  ;;  %v2601_v34 = vor.u32 %v2727_v29, %v2598_v36  ;;  %v2482_v35 = vld [vmem:[%s4209_s4 + $0x24] sm:$0xf0] }
 0x2ee   : > { %1564 = vst [vmem:[#allocation2 + $0x118] sm:$0xff] %v1560_v22  ;;  %v2582_v22 = vld [vmem:[#allocation2 + $0xb8] sm:$0xf0] }
 0x2ef   : > { %1232 = vst [vmem:[#allocation2 + $0x8] sm:$0xff] %v1228_v32  ;;  %v2480_v32 = vld [vmem:[%s4209_s4 + $0x18] sm:$0xf] }
 0x2f0   : > { %v1520_v23 = vpop.permute.xlu0 %1519  ;;  %1855 = vmatpush.bf16.msrb.mxu1 %v2501_v10  ;;  %1912 = vmatpush.bf16.msra.mxu0 %v2505_v5  ;;  %v1532_v39 = vpop.permute.xlu1 %1531  ;;  %v2697_v5 = vld [vmem:[%s4209_s4 + $0x10] sm:$0xf0] }
 0x2f1   : > { %v1535_v25 = vsel %vm750_vm3, %v1520_v23, %v1528_v6  ;;  %v1539_v46 = vsel %vm750_vm3, %v1528_v6, %v1520_v23  ;;  %1874 = vmatpush.bf16.msrb.mxu3 %v2565_v45  ;;  %v1537_v2 = vsel %vm750_vm3, %v3994_v30, %v1532_v39  ;;  %v1541_v4 = vsel %vm750_vm3, %v1532_v39, %v3994_v30  ;;  %v1626_v36 = vpop.permute.xlu2 %1625 }
 0x2f2   : > { %v1549_v13 = vmul.f32 %v4005_v19, %v1535_v25  ;;  %v1550_v1 = vmul.f32 %v4007_v14, %v1539_v46  ;;  %v1553_v47 = vmul.f32 %v4005_v19, %v1537_v2  ;;  %v1554_v38 = vmul.f32 %v4007_v14, %v1541_v4  ;;  %v2574_v4 = vld [vmem:[#allocation2 + $0xa8] sm:$0xf0] }
 0x2f3   : > { %v2477_v25 = vor.u32 %v2697_v5, %v2476_v58  ;;  %v2585_v46 = vor.u32 %v2723_v53, %v2582_v22  ;;  %v2481_v2 = vor.u32 %v2699_v33, %v2480_v32  ;;  %v2577_v43 = vor.u32 %v2721_v0, %v2574_v4 }
 0x2f4   : > { %v1557_v48 = vpack.c.bf16 %v1550_v1, %v1549_v13  ;;  %v1559_v30 = vpack.c.bf16 %v1554_v38, %v1553_v47  ;;  %v2566_v13 = vld [vmem:[#allocation2 + $0x98] sm:$0xf0]  ;;  %v2719_v1 = vld [vmem:[#allocation2 + $0x94] sm:$0xf]  ;;  %v2558_v38 = vld [vmem:[#allocation2 + $0x88] sm:$0xf0] }
 0x2f5   : > { %1875 = vmatpush.bf16.msrb.mxu3 %v2557_v59  ;;  %v2736_v31 = vld [vmem:[#allocation2 + $0x114] sm:$0xf0]  ;;  %v2630_v60 = vld [vmem:[#allocation2 + $0x118] sm:$0xf0]  ;;  %v2569_v47 = vor.u32 %v2719_v1, %v2566_v13  ;;  %v2561_v59 = vor.u32 %v2717_v41, %v2558_v38  ;;  %v2935_v1 = vmov 256.0  }
 0x2f6   : > { %1561 = vst [vmem:[#allocation2 + $0x100] sm:$0xff] %v1557_v48  ;;  %v2702_v7 = vld [vmem:[#allocation2 + $0x4] sm:$0xf0]  ;;  %v2494_v61 = vld [vmem:[#allocation2 + $0x8] sm:$0xf0]  ;;  %2800 = vrcp.f32 %v2935_v1 }
 0x2f7   : > { %1563 = vst [vmem:[#allocation2 + $0x110] sm:$0xff] %v1559_v30  ;;  %v2493_v20 = vor.u32 %v2702_v7, %v2492_v42  ;;  %v2497_v50 = vor.u32 %v2701_v15, %v2494_v61  ;;  %v2488_v48 = vld [vmem:[%s4209_s4 + $0x20] sm:$0xf]  ;;  %v2700_v30 = vld [vmem:[%s4209_s4 + $0x28] sm:$0xf0] }
 0x2f8   : > { %1876 = vmatmul.bf16.vlgmr.msrb.gmra.mxu3 %v4043_v49  ;;  %v1530_v54 = vpop.permute.xlu0 %1529  ;;  %v1522_v57 = vpop.permute.xlu1 %1521  ;;  %v2489_v51 = vor.u32 %v2700_v30, %v2488_v48 }
 0x2f9   : > { %1856 = vmatpush.bf16.msrb.mxu1 %v2493_v20  ;;  %1913 = vmatpush.bf16.msra.mxu0 %v2497_v50  ;;  %v1536_v12 = vsel %vm750_vm3, %v1522_v57, %v1530_v54  ;;  %v1540_v63 = vsel %vm750_vm3, %v1530_v54, %v1522_v57 }
 0x2fa   : > { %v1551_v56 = vmul.f32 %v4005_v19, %v1536_v12  ;;  %v1552_v9 = vmul.f32 %v4007_v14, %v1540_v63  ;;  %v2590_v19 = vld [vmem:[#allocation2 + $0xc8] sm:$0xf0]  ;;  %v2698_v14 = vld [vmem:[%s4209_s4 + $0x1c] sm:$0xf] }
 0x2fb   : > { %v2593_v44 = vor.u32 %v2725_v26, %v2590_v19  ;;  %v2485_v52 = vor.u32 %v2698_v14, %v2482_v35 }
 0x2fc   : > { %v1558_v62 = vpack.c.bf16 %v1552_v9, %v1551_v56  ;;  %1857 = vmatmul.bf16.vlgmr.msrb.gmra.mxu1 %v2469_v40  ;;  %1914 = vmatmul.bf16.vlgmr.msra.gmra.mxu0 %v2469_v40 }
 0x2fd   : > { %1925 = vmatpush.bf16.msra.mxu1 %v2617_v17  ;;  %v2620_v10 = vld [vmem:[#allocation2 + $0x100] sm:$0xf]  ;;  %v2733_v45 = vld [vmem:[#allocation2 + $0x104] sm:$0xf] }
 0x2fe   : > { %1562 = vst [vmem:[#allocation2 + $0x108] sm:$0xff] %v1558_v62  ;;  %v2628_v37 = vld [vmem:[#allocation2 + $0x110] sm:$0xf]  ;;  %v2735_v18 = vld [vmem:[#allocation2 + $0x114] sm:$0xf] }
 0x2ff   : > { %v2629_v11 = vor.u32 %v2736_v31, %v2628_v37  ;;  %v2633_v21 = vor.u32 %v2735_v18, %v2630_v60 }
 0x300   : > { %v1621_v12 = vpop.permute.xlu0 %1620  ;;  %v1631_v29 = vpop.permute.xlu1 %1630 }
 0x301   : > { %1926 = vmatpush.bf16.msra.mxu1 %v2609_v28  ;;  %1893 = vmatpush.bf16.msra.mxu2 %v2629_v11 }
 0x302   : > { %1950 = vmatpush.bf16.msra.mxu3 %v2633_v21 }
 0x305   : > { %1927 = vmatpush.bf16.msra.mxu1 %v2601_v34  ;;  %v2734_v6 = vld [vmem:[#allocation2 + $0x104] sm:$0xf0]  ;;  %v2622_v23 = vld [vmem:[#allocation2 + $0x108] sm:$0xf0] }
 0x306   : > { %v2621_v39 = vor.u32 %v2734_v6, %v2620_v10  ;;  %v2625_v24 = vor.u32 %v2733_v45, %v2622_v23 }
 0x308   : > { %1881 = vmatmul.bf16.gmra.mxu3 %v2485_v52  ;;  %1894 = vmatpush.bf16.msra.mxu2 %v2621_v39  ;;  %v1616_v6 = vpop.permute.xlu1 %1615 }
 0x309   : > { %1928 = vmatpush.bf16.msra.mxu1 %v2593_v44  ;;  %1951 = vmatpush.bf16.msra.mxu3 %v2625_v24 }
 0x30b   : > { %2634 = vmatmul.msk.bf16.vlgmr.msra.gmra.mxu2 %vm1060_vm7, %v2477_v25 }
 0x30c   : > { %1862 = vmatmul.bf16.gmra.mxu1 %v2481_v2  ;;  %1919 = vmatmul.bf16.gmra.mxu0 %v2481_v2 }
 0x30d   : > { %1929 = vmatpush.bf16.msra.mxu1 %v2585_v46 }
 0x311   : > { %1930 = vmatpush.bf16.msra.mxu1 %v2577_v43 }
 0x315   : > { %1931 = vmatpush.bf16.msra.mxu1 %v2569_v47  ;;  %v2801_v47 = vpop.eup %2800 }
 0x316   : > { %v1976_v38 = vmul.f32 256.0, %v2801_v47  ;;  %vm1980_vm9 = vweird.f32 %v2801_v47 }
 0x318   : > { %2636 = vmatmul.msk.bf16.vlgmr.msra.gmra.mxu3 %vm1060_vm7, %v2477_v25  ;;  %v1977_v41 = vsub.f32 1.0, %v1976_v38 }
 0x319   : > { %1932 = vmatpush.bf16.msra.mxu1 %v2561_v59 }
 0x31a   : > { %v1978_v59 = vmul.f32 %v2801_v47, %v1977_v41 }
 0x31b   : > { %2635 = vmatmul.msk.bf16.gmra.mxu2 %vm1060_vm7, %v2489_v51 }
 0x31c   : > { %1933 = vmatmul.bf16.vlgmr.msra.gmra.mxu1 %v4043_v49  ;;  %v1979_v48 = vadd.f32 %v2801_v47, %v1978_v59 }
 0x31e   : > { %v1981_v30 = vsel %vm1980_vm9, %v2801_v47, %v1979_v48 }
 0x328   : > { %2637 = vmatmul.msk.bf16.gmra.mxu3 %vm1060_vm7, %v2489_v51 }
 0x32c   : > { %1938 = vmatmul.bf16.gmra.mxu1 %v2485_v52 }
 0x379   : > { %v1858_v16 = vpop.f32.mrf.mxu1  ;;  %v1915_v20 = vpop.f32.mrf.mxu0 }
 0x37a   : > { %v1916_v23 = vadd.f32 %v1915_v20, %v1616_v6  ;;  %v1859_v25 = vadd.f32 %v1858_v16, %v1616_v6 }
 0x37b   : > { %v1877_v42 = vpop.f32.mrf.mxu3 }
 0x37c   : > { %v1878_v4 = vadd.f32 %v1877_v42, %v1859_v25 }
 0x381   : > { %v1860_v15 = vpop.f32.mrf.mxu1  ;;  %v1917_v57 = vpop.f32.mrf.mxu0 }
 0x382   : > { %v1861_v8 = vadd.f32 %v1860_v15, %v1621_v12  ;;  %v1918_v49 = vadd.f32 %v1917_v57, %v1621_v12  ;;  %v2013_v12 = vld [vmem:[%s4213_s8 + $0x8] sm:$0xff] }
 0x383   : > { %v1879_v3 = vpop.f32.mrf.mxu3 }
 0x384   : > { %v1880_v56 = vadd.f32 %v1879_v3, %v1861_v8  ;;  %v2015_v8 = vld [vmem:[%s4213_s8 + $0x18] sm:$0xff] }
 0x389   : > { %v1863_v7 = vpop.f32.mrf.mxu1  ;;  %v1920_v62 = vpop.f32.mrf.mxu0 }
 0x38a   : > { %v1864_v37 = vadd.f32 %v1863_v7, %v1626_v36  ;;  %v1921_v21 = vadd.f32 %v1920_v62, %v1626_v36  ;;  %v2017_v62 = vld [vmem:[%s4214_s9 + $0x8] sm:$0xff] }
 0x38b   : > { %v1882_v61 = vpop.f32.mrf.mxu3 }
 0x38c   : > { %v1883_v19 = vadd.f32 %v1882_v61, %v1864_v37 }
 0x38e   : > { %v1896_v55 = vpop.f32.mrf.mxu2 }
 0x38f   : > { %v4107_v43 = vadd.f32 %v1896_v55, %v1878_v4  ;;  %v1987_v55 = vld [vmem:[%s4212_s7] sm:$0xff] }
 0x391   : > { %v1865_v50 = vpop.f32.mrf.mxu1  ;;  %v1922_v22 = vpop.f32.mrf.mxu0 }
 0x392   : > { %v1866_v32 = vadd.f32 %v1865_v50, %v1631_v29  ;;  %v1923_v44 = vadd.f32 %v1922_v22, %v1631_v29  ;;  %v1986_v50 = vld [vmem:[%s4211_s6] sm:$0xff] }
 0x393   : > { %v1884_v54 = vpop.f32.mrf.mxu3 }
 0x394   : > { %v1885_v58 = vadd.f32 %v1884_v54, %v1866_v32 }
 0x396   : > { %v1898_v63 = vpop.f32.mrf.mxu2 }
 0x397   : > { %v4087_v31 = vadd.f32 %v1898_v63, %v1880_v56  ;;  %v2014_v63 = vld [vmem:[%s4213_s8 + $0x10] sm:$0xff] }
 0x399   : > { %v1934_v17 = vpop.f32.mrf.mxu1 }
 0x39a   : > { %v1935_v46 = vadd.f32 %v1934_v17, %v1916_v23 }
 0x39b   : > { %v1953_v40 = vpop.f32.mrf.mxu3 }
 0x39c   : > { %v4105_v0 = vadd.f32 %v1953_v40, %v1935_v46  ;;  %v2012_v40 = vld [vmem:[%s4213_s8] sm:$0xff] }
 0x39e   : > { %v1901_v11 = vpop.f32.mrf.mxu2  ;;  %v1963_v13 = vadd.f32 %v4105_v0, %v4107_v43 }
 0x39f   : > { %v4093_v26 = vadd.f32 %v1901_v11, %v1883_v19 }
 0x3a1   : > { %v1936_v27 = vpop.f32.mrf.mxu1 }
 0x3a2   : > { %v1937_v9 = vadd.f32 %v1936_v27, %v1918_v49  ;;  %v2016_v49 = vld [vmem:[%s4214_s9] sm:$0xff] }
 0x3a3   : > { %v1955_v28 = vpop.f32.mrf.mxu3 }
 0x3a4   : > { %v4089_v60 = vadd.f32 %v1955_v28, %v1937_v9 }
 0x3a6   : > { %v1966_v18 = vadd.f32 %v4089_v60, %v4087_v31  ;;  %v1903_v52 = vpop.f32.mrf.mxu2 }
 0x3a7   : > { %v4099_v39 = vadd.f32 %v1903_v52, %v1885_v58 }
 0x3a8   : > { %1967 = vadd.xlane.f32.xlu1 %v1966_v18 }
 0x3a9   : > { %v1939_v34 = vpop.f32.mrf.mxu1 }
 0x3aa   : > { %v1940_v14 = vadd.f32 %v1939_v34, %v1921_v21  ;;  %v2018_v21 = vld [vmem:[%s4214_s9 + $0x10] sm:$0xff] }
 0x3ab   : > { %v1958_v35 = vpop.f32.mrf.mxu3 }
 0x3ac   : > { %v4095_v53 = vadd.f32 %v1958_v35, %v1940_v14 }
 0x3ae   : > { %v1969_v33 = vadd.f32 %v4095_v53, %v4093_v26 }
 0x3b0   : > { %1970 = vadd.xlane.f32.xlu0 %v1969_v33  ;;  %v2019_v33 = vld [vmem:[%s4214_s9 + $0x18] sm:$0xff] }
 0x3b1   : > { %v1941_v10 = vpop.f32.mrf.mxu1 }
 0x3b2   : > { %v1942_v5 = vadd.f32 %v1941_v10, %v1923_v44 }
 0x3b3   : > { %v1960_v45 = vpop.f32.mrf.mxu3 }
 0x3b4   : > { %v4101_v24 = vadd.f32 %v1960_v45, %v1942_v5 }
 0x3b6   : > { %v1972_v2 = vadd.f32 %v4101_v24, %v4099_v39 }
 0x3b8   : > { %1973 = vadd.xlane.f32.xlu2 %v1972_v2 }
 0x3c0   : > { %1964 = vadd.xlane.f32.xlu2 %v1963_v13 }
 0x41b   : > { %v1968_v15 = vpop.xlane.xlu1 %1967 }
 0x41c   : > { %v1983_v7 = vmul.f32 %v1981_v30, %v1968_v15 }
 0x423   : > { %v1971_v51 = vpop.xlane.xlu0 %1970 }
 0x424   : > { %v1984_v3 = vmul.f32 %v1981_v30, %v1971_v51 }
 0x42b   : > { %v1974_v16 = vpop.xlane.xlu2 %1973 }
 0x42c   : > { %v1985_v42 = vmul.f32 %v1981_v30, %v1974_v16 }
 0x42e   : > { %2003 = vmatpush.msrb.mxu0 %v1985_v42 }
 0x430   : > { %2004 = vmatpush.msrb.mxu0 %v1984_v3 }
 0x432   : > { %2005 = vmatpush.msrb.mxu0 %v1983_v7 }
 0x433   : > { %v1965_v61 = vpop.xlane.xlu2 %1964 }
 0x434   : > { %v1982_v20 = vmul.f32 %v1981_v30, %v1965_v61 }
 0x436   : > { %2006 = vmatpush.msrb.mxu0 %v1982_v20 }
 0x437   : > { %2638 = vmatmul.msk.f32.vlgmr.msrb.gmra.mxu0 %vm1060_vm7, %v1986_v50 }
 0x4b4   : > { %v2008_v54 = vpop.f32.mrf.mxu0 }
 0x4b5   : > { %v2009_v57 = vadd.f32 %v2008_v54, %v1987_v55 }
 0x4b7   : > { %v2011_v17 = vmax.f32 %v2009_v57, 0.0 }
 0x4b9   : > { %2048 = vmatpush.msrb.mxu2 %v2011_v17 }
 0x4ba   : > { %2639 = vmatmul.msk.f32.vlgmr.msrb.gmra.mxu2 %vm2020_vm10, %v2012_v40 }
 0x4c2   : > { %2640 = vmatmul.msk.f32.gmra.mxu2 %vm2020_vm10, %v2013_v12 }
 0x4ca   : > { %2641 = vmatmul.msk.f32.gmra.mxu2 %vm2020_vm10, %v2014_v63 }
 0x4d2   : > { %2642 = vmatmul.msk.f32.gmra.mxu2 %vm2020_vm10, %v2015_v8 }
 0x53d   : > { %v2050_v27 = vpop.f32.mrf.mxu2 }
 0x53e   : > { %v2051_v56 = vadd.f32 %v2050_v27, %v2016_v49 }
 0x540   : > { %v2643_v9 = vmul.f32 -1.442695, %v2051_v56 }
 0x542   : > { %2802 = vpow2.f32 %v2643_v9 }
 0x545   : > { %v2053_v28 = vpop.f32.mrf.mxu2 }
 0x546   : > { %v2054_v36 = vadd.f32 %v2053_v28, %v2017_v62 }
 0x548   : > { %v2803_v37 = vpop.eup %2802  ;;  %v2644_v18 = vmul.f32 -1.442695, %v2054_v36 }
 0x549   : > { %v2074_v11 = vadd.f32 1.0, %v2803_v37 }
 0x54a   : > { %2804 = vpow2.f32 %v2644_v18 }
 0x54b   : > { %2806 = vrcp.f32 %v2074_v11  ;;  %v2089_v10 = vand.u32 2147483648, %v2074_v11  ;;  %v2087_v6 = vand.u32 2147483647, %v2074_v11  ;;  %vm2083_vm12 = vweird.f32 %v2074_v11 }
 0x54d   : > { %v2056_v29 = vpop.f32.mrf.mxu2  ;;  %v2090_v4 = vor.u32 1.1754944e-38, %v2089_v10  ;;  %vm2088_vm14 = vcmp.eq.f32.partialorder %v2087_v6, 8.507059e+37  ;;  %v2823_v6 = vld [vmem:[%s3084_s28 + $0x28] sm:$0xff] }
 0x54e   : > { %v2057_v34 = vadd.f32 %v2056_v29, %v2018_v21  ;;  %v2818_v29 = vld [vmem:[%s3084_s28] sm:$0xff] }
 0x550   : > { %v2805_v19 = vpop.eup %2804  ;;  %v2645_v14 = vmul.f32 -1.442695, %v2057_v34 }
 0x551   : > { %v2807_v35 = vpop.eup %2806  ;;  %v2075_v22 = vadd.f32 1.0, %v2805_v19  ;;  %v2819_v19 = vld [vmem:[%s3084_s28 + $0x8] sm:$0xff] }
 0x552   : > { %2808 = vpow2.f32 %v2645_v14  ;;  %v2079_v32 = vmul.f32 %v2807_v35, %v2074_v11  ;;  %vm2084_vm11 = vweird.f32 %v2807_v35 }
 0x553   : > { %2810 = vrcp.f32 %v2075_v22  ;;  %vm2085_vm13 = vmor %vm2083_vm12, %vm2084_vm11  ;;  %v2104_v41 = vand.u32 2147483648, %v2075_v22  ;;  %v2102_v48 = vand.u32 2147483647, %v2075_v22  ;;  %vm2098_vm0 = vweird.f32 %v2075_v22 }
 0x554   : > { %v2080_v44 = vsub.f32 1.0, %v2079_v32 }
 0x555   : > { %v2059_v52 = vpop.f32.mrf.mxu2  ;;  %v2105_v15 = vor.u32 1.1754944e-38, %v2104_v41  ;;  %vm2103_vm2 = vcmp.eq.f32.partialorder %v2102_v48, 8.507059e+37 }
 0x556   : > { %v2060_v58 = vadd.f32 %v2059_v52, %v2019_v33  ;;  %v2081_v5 = vmul.f32 %v2807_v35, %v2080_v44  ;;  %v2821_v33 = vld [vmem:[%s3084_s28 + $0x18] sm:$0xff] }
 0x558   : > { %v2809_v45 = vpop.eup %2808  ;;  %v2646_v23 = vmul.f32 -1.442695, %v2060_v58  ;;  %v2082_v25 = vadd.f32 %v2807_v35, %v2081_v5  ;;  %v2822_v5 = vld [vmem:[%s3084_s28 + $0x20] sm:$0xff] }
 0x559   : > { %v2811_v46 = vpop.eup %2810  ;;  %v2076_v2 = vadd.f32 1.0, %v2809_v45 }
 0x55a   : > { %2812 = vpow2.f32 %v2646_v23  ;;  %v2086_v13 = vsel %vm2085_vm13, %v2807_v35, %v2082_v25  ;;  %v2094_v1 = vmul.f32 %v2811_v46, %v2075_v22  ;;  %vm2099_vm15 = vweird.f32 %v2811_v46  ;;  %v2820_v22 = vld [vmem:[%s3084_s28 + $0x10] sm:$0xff] }
 0x55b   : > { %2814 = vrcp.f32 %v2076_v2  ;;  %v2091_v47 = vsel %vm2088_vm14, %v2090_v4, %v2086_v13  ;;  %vm2100_vm1 = vmor %vm2098_vm0, %vm2099_vm15  ;;  %v2119_v50 = vand.u32 2147483648, %v2076_v2  ;;  %v2117_v54 = vand.u32 2147483647, %v2076_v2  ;;  %v2824_v23 = vld [vmem:[%s3084_s28 + $0x30] sm:$0xff] }
 0x55c   : > { %2140 = vperm.xlu2 %2798, %v2091_v47   ;;  %v2095_v38 = vsub.f32 1.0, %v2094_v1  ;;  %vm2113_vm4 = vweird.f32 %v2076_v2 }
 0x55d   : > { %v2120_v40 = vor.u32 1.1754944e-38, %v2119_v50  ;;  %vm2118_vm6 = vcmp.eq.f32.partialorder %v2117_v54, 8.507059e+37 }
 0x55e   : > { %v2096_v59 = vmul.f32 %v2811_v46, %v2095_v38 }
 0x560   : > { %v2813_v30 = vpop.eup %2812  ;;  %v2097_v51 = vadd.f32 %v2811_v46, %v2096_v59 }
 0x561   : > { %v2815_v16 = vpop.eup %2814  ;;  %v2077_v42 = vadd.f32 1.0, %v2813_v30 }
 0x562   : > { %v2101_v3 = vsel %vm2100_vm1, %v2811_v46, %v2097_v51  ;;  %v2109_v7 = vmul.f32 %v2815_v16, %v2076_v2  ;;  %vm2114_vm3 = vweird.f32 %v2815_v16  ;;  %v2825_v46 = vld [vmem:[%s3084_s28 + $0x38] sm:$0xff] }
 0x563   : > { %2816 = vrcp.f32 %v2077_v42  ;;  %v2106_v61 = vsel %vm2103_vm2, %v2105_v15, %v2101_v3  ;;  %vm2115_vm5 = vmor %vm2113_vm4, %vm2114_vm3  ;;  %v2134_v27 = vand.u32 2147483648, %v2077_v42  ;;  %v2132_v9 = vand.u32 2147483647, %v2077_v42 }
 0x564   : > { %2145 = vperm.xlu0 %2799, %v2106_v61   ;;  %v2110_v20 = vsub.f32 1.0, %v2109_v7  ;;  %vm2128_vm8 = vweird.f32 %v2077_v42 }
 0x565   : > { %v2135_v28 = vor.u32 1.1754944e-38, %v2134_v27  ;;  %vm2133_vm10 = vcmp.eq.f32.partialorder %v2132_v9, 8.507059e+37 }
 0x566   : > { %v2111_v55 = vmul.f32 %v2815_v16, %v2110_v20 }
 0x568   : > { %v2112_v57 = vadd.f32 %v2815_v16, %v2111_v55 }
 0x569   : > { %v2817_v17 = vpop.eup %2816 }
 0x56a   : > { %v2116_v12 = vsel %vm2115_vm5, %v2815_v16, %v2112_v57  ;;  %v2124_v63 = vmul.f32 %v2817_v17, %v2077_v42  ;;  %vm2129_vm7 = vweird.f32 %v2817_v17 }
 0x56b   : > { %v2121_v8 = vsel %vm2118_vm6, %v2120_v40, %v2116_v12  ;;  %vm2130_vm9 = vmor %vm2128_vm8, %vm2129_vm7 }
 0x56c   : > { %2150 = vperm.xlu1 %2797, %v2121_v8   ;;  %v2125_v49 = vsub.f32 1.0, %v2124_v63 }
 0x56e   : > { %v2126_v56 = vmul.f32 %v2817_v17, %v2125_v49 }
 0x570   : > { %v2127_v62 = vadd.f32 %v2817_v17, %v2126_v56 }
 0x572   : > { %v2131_v36 = vsel %vm2130_vm9, %v2817_v17, %v2127_v62 }
 0x573   : > { %v2136_v37 = vsel %vm2133_vm10, %v2135_v28, %v2131_v36 }
 0x574   : > { %2155 = vperm.xlu0 %2799, %v2136_v37  }
 0x5b6   : > { %v2141_v18 = vpop.permute.xlu2 %2140 }
 0x5b7   : > { %v2158_v11 = vmul.f32 %v2141_v18, %v4107_v43  ;;  %v2159_v21 = vmul.f32 %v2141_v18, %v4105_v0 }
 0x5b9   : > { %v2166_v34 = vadd.f32 %v2818_v29, %v2158_v11  ;;  %v2167_v14 = vadd.f32 %v2819_v19, %v2159_v21 }
 0x5bb   : > { %2174 = vst [vmem:[%s4148_s27] sm:$0xff] %v2166_v34 }
 0x5bc   : > { %2175 = vst [vmem:[%s4148_s27 + $0x8] sm:$0xff] %v2167_v14 }
 0x5d6   : > { %v2146_v35 = vpop.permute.xlu0 %2145 }
 0x5d7   : > { %v2160_v43 = vmul.f32 %v2146_v35, %v4087_v31  ;;  %v2161_v0 = vmul.f32 %v2146_v35, %v4089_v60 }
 0x5d9   : > { %v2168_v32 = vadd.f32 %v2820_v22, %v2160_v43  ;;  %v2169_v44 = vadd.f32 %v2821_v33, %v2161_v0 }
 0x5db   : > { %2176 = vst [vmem:[%s4148_s27 + $0x10] sm:$0xff] %v2168_v32 }
 0x5dc   : > { %2177 = vst [vmem:[%s4148_s27 + $0x18] sm:$0xff] %v2169_v44 }
 0x5de   : > { %v2151_v52 = vpop.permute.xlu1 %2150 }
 0x5df   : > { %v2162_v10 = vmul.f32 %v2151_v52, %v4093_v26  ;;  %v2163_v58 = vmul.f32 %v2151_v52, %v4095_v53 }
 0x5e1   : > { %v2170_v31 = vadd.f32 %v2822_v5, %v2162_v10  ;;  %v2171_v45 = vadd.f32 %v2823_v6, %v2163_v58 }
 0x5e3   : > { %2178 = vst [vmem:[%s4148_s27 + $0x20] sm:$0xff] %v2170_v31 }
 0x5e4   : > { %2179 = vst [vmem:[%s4148_s27 + $0x28] sm:$0xff] %v2171_v45 }
 0x5e6   : > { %v2156_v60 = vpop.permute.xlu0 %2155 }
 0x5e7   : > { %v2164_v26 = vmul.f32 %v2156_v60, %v4099_v39  ;;  %v2165_v53 = vmul.f32 %v2156_v60, %v4101_v24 }
 0x5e9   : > { %v2172_v25 = vadd.f32 %v2824_v23, %v2164_v26  ;;  %v2173_v2 = vadd.f32 %v2825_v46, %v2165_v53 }
 0x5eb   : > { %2180 = vst [vmem:[%s4148_s27 + $0x30] sm:$0xff] %v2172_v25 }
 0x5ec   : > { %2181 = vst [vmem:[%s4148_s27 + $0x38] sm:$0xff] %v2173_v2 }
 0x5ed   : > { %2883 = shalt.err (!%p2880_p4)
}
 0x5ee   : > { %s2936_s18 = smov 256  }
 0x5ef   : > { %2740 = dma.vmem_to_hbm [thread:$0]  (%p3042_p11), %s2196_s11, 1024, %s2198_s26, %s2183_s17, %s2936_s18, %s2936_s18, %s4236_s24  }
 0x5f0 PF: > { %s2212_s27 = sand.u32 1, %s2910_s13   ;;  %p4241_p7 = scmp.ge.s32.totalorder %s2922_s16, 2 }
 0x5f1   : > { %s2213_s22 = scalar_lea.sflag [#allocation5], %s2212_s27 }
 0x5f2   : > { %p2747_p5 = pnand %p4241_p7, %p3046_p12 }
 0x5f4   : > { %p2748_p8 = pneg %p2747_p5 }
 0x5f6   : > { %2905 = dma.done.wait (%p2748_p8), %s2213_s22, 1024  }
 0x5f7   : > { %2907 = vsyncadd (%p2748_p8), %s2213_s22, 4294966272  ;;  %s4242_s16 = sld [smem:[#allocation10_spill]]  ;;  %s4245_s13 = smov %s2914_s14 }
 0x5f8   : > { %s4243_s29 = sld [smem:[#allocation9_spill]] }
 0x5f9   : > { %s4244_s15 = sld [smem:[#allocation11_spill]] }
 0x5fd   : > { %p23_p10 = scmp.ge.s32.totalorder %s4242_s16, 4  }
 0x5fe   : > { %s4246_s14 = smov %s4243_s29 }
 0x5ff   :  { %25 = sbr.rel (!%p23_p10) target bundleno = 5 (0x5), region = 112 }
 0x604   :  { %2219 = vsyncpa [#allocation4], 1 }
 0x605   :  { %2221 = vsyncpa [#allocation4 + $0x1], 1 }
 0x606   :  { %2222 = vsyncpa [#allocation5], 1 }
 0x607   :  { %2224 = vsyncpa [#allocation5 + $0x1], 1 }

</bundles_post_ra>
